<compile_context>
chip_gen: v7x
topology: tpu7x:2x2x1
jax: 0.10.0
libtpu: 0.0.40
codegen_flags: <defaults>
</compile_context>

<pallas_src>
import functools

import jax
import jax.numpy as jnp
from jax import lax
from jax.experimental import pallas as pl
from jax.experimental.pallas import tpu as pltpu


def _mrda_kernel(x_ref, w1_ref, b1_ref, w2_ref, b2_ref, o_ref, *, H, W, C, B):
    WC = W * C

    # One lane-dense (1, WC) row per 3x3 tap (BN scale already folded in).
    w1_rows = [w1_ref[k:k + 1, :] for k in range(9)]
    w2_rows = [w2_ref[k:k + 1, :] for k in range(9)]
    b1 = b1_ref[...]            # (1, WC) float32 (folded BN bias)
    b2 = b2_ref[...]            # (1, WC) float32

    # Zero-padding masks for the 8 shifted taps; hoisted once, shared by both
    # convs and all B images in this grid step.
    row = lax.broadcasted_iota(jnp.int32, (H, 1), 0)
    lane = lax.broadcasted_iota(jnp.int32, (1, WC), 1)
    rmask = {-1: row >= 1, 0: None, 1: row <= H - 2}
    lmask = {-1: lane >= C, 0: None, 1: lane < (W - 1) * C}
    masks = {}
    for dh in (-1, 0, 1):
        for dw in (-1, 0, 1):
            rm, lm = rmask[dh], lmask[dw]
            if rm is None:
                masks[(dh, dw)] = lm
            elif lm is None:
                masks[(dh, dw)] = rm
            else:
                masks[(dh, dw)] = rm & lm

    def dwconv_bn(src, w_rows, bias):
        """Depthwise 3x3 conv (padding=1, stride=1) + folded BN on an (H, W*C) slab.

        Each tap is a lane/sublane rotation of `src` (pltpu.roll -> XLU slot), so
        the whole conv stays in vregs; wrapped-around entries are zeroed by masks,
        reproducing the zero padding of the reference conv.
        """
        contribs = []
        for dh in (-1, 0, 1):
            for dw in (-1, 0, 1):
                tap = src
                if dh != 0:
                    tap = pltpu.roll(tap, shift=(-dh) % H, axis=0)
                if dw != 0:
                    tap = pltpu.roll(tap, shift=(-dw * C) % WC, axis=1)
                contrib = tap * w_rows[3 * (dh + 1) + (dw + 1)]
                m = masks[(dh, dw)]
                if m is not None:
                    contrib = jnp.where(m, contrib, 0.0)
                contribs.append(contrib)
        # Bias folded into chain A's init; two interleaved f32 chains break the
        # 9-tap serial VALU dependency.
        acc_a = contribs[0].astype(jnp.float32) + bias
        acc_b = contribs[1].astype(jnp.float32)
        for k in range(2, 9):
            if k % 2 == 0:
                acc_a = acc_a + contribs[k]
            else:
                acc_b = acc_b + contribs[k]
        return acc_a + acc_b

    for b in range(B):          # static unroll: B images per grid step
        x = x_ref[b]            # (H, W*C); also the residual identity
        out1 = jnp.maximum(dwconv_bn(x, w1_rows, b1), 0.0).astype(x.dtype)
        out2 = dwconv_bn(out1, w2_rows, b2)
        o_ref[b] = jnp.maximum(out2 + x.astype(jnp.float32), 0.0).astype(o_ref.dtype)


def prepare_mrda_params(w1, s1, b1, w2, s2, b2, *, W, compute_dtype=jnp.float32):
    """Fold BN scales into the depthwise taps and tile per-channel params over W.

    Call ONCE at model-load time (inference); the result is reused by every
    mrda_forward call (no per-call jnp.tile / HBM writes).
    Set compute_dtype=jnp.bfloat16 on v6e/v7x for ~2x VPU rate / half the DMA
    bytes; keep float32 on v5e (no bf16 VALU) or when tight tolerance is needed.
    """
    C = w1.shape[-1]
    WC = W * C
    w1t = jnp.tile((w1 * s1[None, None, :]).astype(compute_dtype), (1, 1, W)).reshape(9, WC)
    w2t = jnp.tile((w2 * s2[None, None, :]).astype(compute_dtype), (1, 1, W)).reshape(9, WC)
    b1t = jnp.tile(b1.astype(jnp.float32), W).reshape(1, WC)
    b2t = jnp.tile(b2.astype(jnp.float32), W).reshape(1, WC)
    return dict(w1=w1t, b1=b1t, w2=w2t, b2=b2t, W=W, C=C)


def mrda_forward(x_merged, params, *, images_per_step=None):
    """MRDA forward on the lane-merged layout.

    x_merged: (N, H, W*C) with lane index = w*C + c.  Returns the same layout in
    float32.  Production callers should keep this layout end-to-end; the
    NCHW <-> merged helpers below exist only for parity with the PyTorch module.
    """
    N, H, WC = x_merged.shape
    W, C = params["W"], params["C"]
    assert WC == W * C

    if images_per_step is None:
        # Amortize per-step overhead while keeping >= 2 parallel steps (v7x TCs).
        images_per_step = N // 2 if (N >= 2 and N % 2 == 0) else 1
    B = images_per_step
    assert N % B == 0, "images_per_step must divide the batch"

    x_merged = x_merged.astype(params["w1"].dtype)   # no-op for the f32 path

    kernel = functools.partial(_mrda_kernel, H=H, W=W, C=C, B=B)
    return pl.pallas_call(
        kernel,
        out_shape=jax.ShapeDtypeStruct((N, H, WC), jnp.float32),
        grid_spec=pltpu.PrefetchScalarGridSpec(
            num_scalar_prefetch=0,
            grid=(N // B,),
            in_specs=[
                pl.BlockSpec((B, H, WC), lambda n: (n, 0, 0)),
                pl.BlockSpec((9, WC), lambda n: (0, 0)),
                pl.BlockSpec((1, WC), lambda n: (0, 0)),
                pl.BlockSpec((9, WC), lambda n: (0, 0)),
                pl.BlockSpec((1, WC), lambda n: (0, 0)),
            ],
            out_specs=pl.BlockSpec((B, H, WC), lambda n: (n, 0, 0)),
        ),
        compiler_params=pltpu.CompilerParams(
            dimension_semantics=("parallel",),
        ),
    )(x_merged, params["w1"], params["b1"], params["w2"], params["b2"])


# ---- NCHW <-> lane-merged helpers (PyTorch-interface compatibility only) ------
def nchw_to_merged(x_nchw):
    N, C, H, W = x_nchw.shape
    return jnp.transpose(x_nchw, (0, 2, 3, 1)).reshape(N, H, W * C)


def merged_to_nchw(y_merged, C):
    N, H, WC = y_merged.shape
    W = WC // C
    return jnp.transpose(y_merged.reshape(N, H, W, C), (0, 3, 1, 2))


def _ref_forward(x_nchw, w1, s1, b1, w2, s2, b2):
    """Pure-JAX reference using lax.conv with feature_group_count (matches torch)."""
    C = x_nchw.shape[1]

    def dwconv(a, w_hwc):
        w_oihw = jnp.transpose(w_hwc, (2, 0, 1))[:, None, :, :]        # (C,1,3,3)
        return lax.conv_general_dilated(
            a, w_oihw, window_strides=(1, 1), padding=((1, 1), (1, 1)),
            feature_group_count=C,
            dimension_numbers=("NCHW", "OIHW", "NCHW"))

    def bn(a, s, b):
        return a * s[None, :, None, None] + b[None, :, None, None]

    out = jnp.maximum(bn(dwconv(x_nchw, w1), s1, b1), 0.0)
    out = bn(dwconv(out, w2), s2, b2) + x_nchw
    return jnp.maximum(out, 0.0)


if __name__ == "__main__":
    # inplanes == planes (required: conv3x3 has groups=out_planes); W*C = 128 -> lane-dense
    N, C, H, W = 4, 8, 16, 16
    eps = 1e-5

    key = jax.random.PRNGKey(0)
    ks = jax.random.split(key, 12)
    x_nchw = jax.random.normal(ks[0], (N, C, H, W), jnp.float32)

    # depthwise conv weights, stored (kh, kw, C)
    w1 = 0.2 * jax.random.normal(ks[1], (3, 3, C), jnp.float32)
    w2 = 0.2 * jax.random.normal(ks[2], (3, 3, C), jnp.float32)

    # BN1 params (inference mode, folded into scale/bias)
    g1 = 1.0 + 0.1 * jax.random.normal(ks[3], (C,), jnp.float32)
    be1 = 0.1 * jax.random.normal(ks[4], (C,), jnp.float32)
    m1 = 0.1 * jax.random.normal(ks[5], (C,), jnp.float32)
    v1 = jnp.abs(jax.random.normal(ks[6], (C,), jnp.float32)) + 0.5
    s1 = g1 / jnp.sqrt(v1 + eps)
    b1 = be1 - m1 * s1

    # BN2 params
    g2 = 1.0 + 0.1 * jax.random.normal(ks[7], (C,), jnp.float32)
    be2 = 0.1 * jax.random.normal(ks[8], (C,), jnp.float32)
    m2 = 0.1 * jax.random.normal(ks[9], (C,), jnp.float32)
    v2 = jnp.abs(jax.random.normal(ks[10], (C,), jnp.float32)) + 0.5
    s2 = g2 / jnp.sqrt(v2 + eps)
    b2 = be2 - m2 * s2

    # One-time parameter preparation (outside the per-call path).
    params = prepare_mrda_params(w1, s1, b1, w2, s2, b2, W=W)

    # One-time layout change for the demo; production callers keep the merged layout.
    x_merged = nchw_to_merged(x_nchw)

    out_merged = mrda_forward(x_merged, params)     # (N, H, W*C) f32
    out_merged = jax.block_until_ready(out_merged)
    out = merged_to_nchw(out_merged, C)

    ref = _ref_forward(x_nchw, w1, s1, b1, w2, s2, b2)
    assert out.shape == (N, C, H, W)
    assert jnp.allclose(out, ref, atol=1e-4, rtol=1e-4), float(
        jnp.max(jnp.abs(out - ref)))

    print("KERNEL_OK")
</pallas_src>

<mosaic_0001>
module attributes {stable_mosaic.version = 11 : i64} {
  func.func @_mrda_kernel(%arg0: i32, %arg1: memref<2x16x128xf32, #tpu.memory_space<vmem>>, %arg2: memref<9x128xf32, #tpu.memory_space<vmem>>, %arg3: memref<1x128xf32, #tpu.memory_space<vmem>>, %arg4: memref<9x128xf32, #tpu.memory_space<vmem>>, %arg5: memref<1x128xf32, #tpu.memory_space<vmem>>, %arg6: memref<2x16x128xf32, #tpu.memory_space<vmem>>) attributes {dimension_semantics = [#tpu.dimension_semantics<parallel>], iteration_bounds = array<i64: 2>, scalar_prefetch = 0 : i64, scratch_operands = 0 : i64, tpu.core_type = #tpu.core_type<tc>, window_params = [{transform_indices = @transform_0, window_bounds = array<i64: 2, 16, 128>}, {pipeline_mode = #tpu.pipeline_mode<synchronous>, transform_indices = @transform_1, window_bounds = array<i64: 9, 128>}, {pipeline_mode = #tpu.pipeline_mode<synchronous>, transform_indices = @transform_2, window_bounds = array<i64: 1, 128>}, {pipeline_mode = #tpu.pipeline_mode<synchronous>, transform_indices = @transform_3, window_bounds = array<i64: 9, 128>}, {pipeline_mode = #tpu.pipeline_mode<synchronous>, transform_indices = @transform_4, window_bounds = array<i64: 1, 128>}, {transform_indices = @transform_5, window_bounds = array<i64: 2, 16, 128>}]} {
    %c0 = arith.constant 0 : index
    %c0_0 = arith.constant 0 : index
    %0 = vector.load %arg2[%c0, %c0_0] : memref<9x128xf32, #tpu.memory_space<vmem>>, vector<1x128xf32>
    %c1 = arith.constant 1 : index
    %c0_1 = arith.constant 0 : index
    %1 = vector.load %arg2[%c1, %c0_1] : memref<9x128xf32, #tpu.memory_space<vmem>>, vector<1x128xf32>
    %c2 = arith.constant 2 : index
    %c0_2 = arith.constant 0 : index
    %2 = vector.load %arg2[%c2, %c0_2] : memref<9x128xf32, #tpu.memory_space<vmem>>, vector<1x128xf32>
    %c3 = arith.constant 3 : index
    %c0_3 = arith.constant 0 : index
    %3 = vector.load %arg2[%c3, %c0_3] : memref<9x128xf32, #tpu.memory_space<vmem>>, vector<1x128xf32>
    %c4 = arith.constant 4 : index
    %c0_4 = arith.constant 0 : index
    %4 = vector.load %arg2[%c4, %c0_4] : memref<9x128xf32, #tpu.memory_space<vmem>>, vector<1x128xf32>
    %c5 = arith.constant 5 : index
    %c0_5 = arith.constant 0 : index
    %5 = vector.load %arg2[%c5, %c0_5] : memref<9x128xf32, #tpu.memory_space<vmem>>, vector<1x128xf32>
    %c6 = arith.constant 6 : index
    %c0_6 = arith.constant 0 : index
    %6 = vector.load %arg2[%c6, %c0_6] : memref<9x128xf32, #tpu.memory_space<vmem>>, vector<1x128xf32>
    %c7 = arith.constant 7 : index
    %c0_7 = arith.constant 0 : index
    %7 = vector.load %arg2[%c7, %c0_7] : memref<9x128xf32, #tpu.memory_space<vmem>>, vector<1x128xf32>
    %c8 = arith.constant 8 : index
    %c0_8 = arith.constant 0 : index
    %8 = vector.load %arg2[%c8, %c0_8] : memref<9x128xf32, #tpu.memory_space<vmem>>, vector<1x128xf32>
    %c0_9 = arith.constant 0 : index
    %c0_10 = arith.constant 0 : index
    %9 = vector.load %arg4[%c0_9, %c0_10] : memref<9x128xf32, #tpu.memory_space<vmem>>, vector<1x128xf32>
    %c1_11 = arith.constant 1 : index
    %c0_12 = arith.constant 0 : index
    %10 = vector.load %arg4[%c1_11, %c0_12] : memref<9x128xf32, #tpu.memory_space<vmem>>, vector<1x128xf32>
    %c2_13 = arith.constant 2 : index
    %c0_14 = arith.constant 0 : index
    %11 = vector.load %arg4[%c2_13, %c0_14] : memref<9x128xf32, #tpu.memory_space<vmem>>, vector<1x128xf32>
    %c3_15 = arith.constant 3 : index
    %c0_16 = arith.constant 0 : index
    %12 = vector.load %arg4[%c3_15, %c0_16] : memref<9x128xf32, #tpu.memory_space<vmem>>, vector<1x128xf32>
    %c4_17 = arith.constant 4 : index
    %c0_18 = arith.constant 0 : index
    %13 = vector.load %arg4[%c4_17, %c0_18] : memref<9x128xf32, #tpu.memory_space<vmem>>, vector<1x128xf32>
    %c5_19 = arith.constant 5 : index
    %c0_20 = arith.constant 0 : index
    %14 = vector.load %arg4[%c5_19, %c0_20] : memref<9x128xf32, #tpu.memory_space<vmem>>, vector<1x128xf32>
    %c6_21 = arith.constant 6 : index
    %c0_22 = arith.constant 0 : index
    %15 = vector.load %arg4[%c6_21, %c0_22] : memref<9x128xf32, #tpu.memory_space<vmem>>, vector<1x128xf32>
    %c7_23 = arith.constant 7 : index
    %c0_24 = arith.constant 0 : index
    %16 = vector.load %arg4[%c7_23, %c0_24] : memref<9x128xf32, #tpu.memory_space<vmem>>, vector<1x128xf32>
    %c8_25 = arith.constant 8 : index
    %c0_26 = arith.constant 0 : index
    %17 = vector.load %arg4[%c8_25, %c0_26] : memref<9x128xf32, #tpu.memory_space<vmem>>, vector<1x128xf32>
    %c0_27 = arith.constant 0 : index
    %c0_28 = arith.constant 0 : index
    %18 = vector.load %arg3[%c0_27, %c0_28] : memref<1x128xf32, #tpu.memory_space<vmem>>, vector<1x128xf32>
    %c0_29 = arith.constant 0 : index
    %c0_30 = arith.constant 0 : index
    %19 = vector.load %arg5[%c0_29, %c0_30] : memref<1x128xf32, #tpu.memory_space<vmem>>, vector<1x128xf32>
    %20 = tpu.iota {dimensions = array<i32: 0>} : vector<16x1xi32>
    %21 = tpu.iota {dimensions = array<i32: 1>} : vector<1x128xi32>
    %c1_i32 = arith.constant 1 : i32
    %22 = vector.broadcast %c1_i32 : i32 to vector<16x1xi32>
    %23 = arith.cmpi sge, %20, %22 : vector<16x1xi32>
    %c14_i32 = arith.constant 14 : i32
    %24 = vector.broadcast %c14_i32 : i32 to vector<16x1xi32>
    %25 = arith.cmpi sle, %20, %24 : vector<16x1xi32>
    %c8_i32 = arith.constant 8 : i32
    %26 = vector.broadcast %c8_i32 : i32 to vector<1x128xi32>
    %27 = arith.cmpi sge, %21, %26 : vector<1x128xi32>
    %c120_i32 = arith.constant 120 : i32
    %28 = vector.broadcast %c120_i32 : i32 to vector<1x128xi32>
    %29 = arith.cmpi slt, %21, %28 : vector<1x128xi32>
    %30 = vector.broadcast %23 : vector<16x1xi1> to vector<16x128xi1>
    %31 = vector.broadcast %27 : vector<1x128xi1> to vector<16x128xi1>
    %32 = arith.andi %30, %31 : vector<16x128xi1>
    %33 = vector.broadcast %23 : vector<16x1xi1> to vector<16x128xi1>
    %34 = vector.broadcast %29 : vector<1x128xi1> to vector<16x128xi1>
    %35 = arith.andi %33, %34 : vector<16x128xi1>
    %36 = vector.broadcast %25 : vector<16x1xi1> to vector<16x128xi1>
    %37 = vector.broadcast %27 : vector<1x128xi1> to vector<16x128xi1>
    %38 = arith.andi %36, %37 : vector<16x128xi1>
    %39 = vector.broadcast %25 : vector<16x1xi1> to vector<16x128xi1>
    %40 = vector.broadcast %29 : vector<1x128xi1> to vector<16x128xi1>
    %41 = arith.andi %39, %40 : vector<16x128xi1>
    %c0_31 = arith.constant 0 : index
    %c0_32 = arith.constant 0 : index
    %c0_33 = arith.constant 0 : index
    %42 = vector.load %arg1[%c0_31, %c0_32, %c0_33] : memref<2x16x128xf32, #tpu.memory_space<vmem>>, vector<1x16x128xf32>
    %43 = vector.shape_cast %42 : vector<1x16x128xf32> to vector<16x128xf32>
    %c1_i32_34 = arith.constant 1 : i32
    %44 = tpu.dynamic_rotate %43 by %c1_i32_34 dim 0 : vector<16x128xf32>, i32 -> vector<16x128xf32>
    %c8_i32_35 = arith.constant 8 : i32
    %45 = tpu.dynamic_rotate %44 by %c8_i32_35 dim 1 : vector<16x128xf32>, i32 -> vector<16x128xf32>
    %46 = vector.broadcast %0 : vector<1x128xf32> to vector<16x128xf32>
    %47 = arith.mulf %45, %46 : vector<16x128xf32>
    %cst = arith.constant 0.000000e+00 : f32
    %48 = vector.broadcast %cst : f32 to vector<16x128xf32>
    %49 = arith.select %32, %47, %48 : vector<16x128xi1>, vector<16x128xf32>
    %c1_i32_36 = arith.constant 1 : i32
    %50 = tpu.dynamic_rotate %43 by %c1_i32_36 dim 0 : vector<16x128xf32>, i32 -> vector<16x128xf32>
    %51 = vector.broadcast %1 : vector<1x128xf32> to vector<16x128xf32>
    %52 = arith.mulf %50, %51 : vector<16x128xf32>
    %cst_37 = arith.constant 0.000000e+00 : f32
    %53 = vector.shape_cast %23 : vector<16x1xi1> to vector<16x1xi1>
    %54 = vector.broadcast %53 : vector<16x1xi1> to vector<16x128xi1>
    %55 = vector.broadcast %cst_37 : f32 to vector<16x128xf32>
    %56 = arith.select %54, %52, %55 : vector<16x128xi1>, vector<16x128xf32>
    %c1_i32_38 = arith.constant 1 : i32
    %57 = tpu.dynamic_rotate %43 by %c1_i32_38 dim 0 : vector<16x128xf32>, i32 -> vector<16x128xf32>
    %c120_i32_39 = arith.constant 120 : i32
    %58 = tpu.dynamic_rotate %57 by %c120_i32_39 dim 1 : vector<16x128xf32>, i32 -> vector<16x128xf32>
    %59 = vector.broadcast %2 : vector<1x128xf32> to vector<16x128xf32>
    %60 = arith.mulf %58, %59 : vector<16x128xf32>
    %cst_40 = arith.constant 0.000000e+00 : f32
    %61 = vector.broadcast %cst_40 : f32 to vector<16x128xf32>
    %62 = arith.select %35, %60, %61 : vector<16x128xi1>, vector<16x128xf32>
    %c8_i32_41 = arith.constant 8 : i32
    %63 = tpu.dynamic_rotate %43 by %c8_i32_41 dim 1 : vector<16x128xf32>, i32 -> vector<16x128xf32>
    %64 = vector.broadcast %3 : vector<1x128xf32> to vector<16x128xf32>
    %65 = arith.mulf %63, %64 : vector<16x128xf32>
    %cst_42 = arith.constant 0.000000e+00 : f32
    %66 = vector.shape_cast %27 : vector<1x128xi1> to vector<1x128xi1>
    %67 = vector.broadcast %66 : vector<1x128xi1> to vector<16x128xi1>
    %68 = vector.broadcast %cst_42 : f32 to vector<16x128xf32>
    %69 = arith.select %67, %65, %68 : vector<16x128xi1>, vector<16x128xf32>
    %70 = vector.broadcast %4 : vector<1x128xf32> to vector<16x128xf32>
    %71 = arith.mulf %43, %70 : vector<16x128xf32>
    %c120_i32_43 = arith.constant 120 : i32
    %72 = tpu.dynamic_rotate %43 by %c120_i32_43 dim 1 : vector<16x128xf32>, i32 -> vector<16x128xf32>
    %73 = vector.broadcast %5 : vector<1x128xf32> to vector<16x128xf32>
    %74 = arith.mulf %72, %73 : vector<16x128xf32>
    %cst_44 = arith.constant 0.000000e+00 : f32
    %75 = vector.shape_cast %29 : vector<1x128xi1> to vector<1x128xi1>
    %76 = vector.broadcast %75 : vector<1x128xi1> to vector<16x128xi1>
    %77 = vector.broadcast %cst_44 : f32 to vector<16x128xf32>
    %78 = arith.select %76, %74, %77 : vector<16x128xi1>, vector<16x128xf32>
    %c15_i32 = arith.constant 15 : i32
    %79 = tpu.dynamic_rotate %43 by %c15_i32 dim 0 : vector<16x128xf32>, i32 -> vector<16x128xf32>
    %c8_i32_45 = arith.constant 8 : i32
    %80 = tpu.dynamic_rotate %79 by %c8_i32_45 dim 1 : vector<16x128xf32>, i32 -> vector<16x128xf32>
    %81 = vector.broadcast %6 : vector<1x128xf32> to vector<16x128xf32>
    %82 = arith.mulf %80, %81 : vector<16x128xf32>
    %cst_46 = arith.constant 0.000000e+00 : f32
    %83 = vector.broadcast %cst_46 : f32 to vector<16x128xf32>
    %84 = arith.select %38, %82, %83 : vector<16x128xi1>, vector<16x128xf32>
    %c15_i32_47 = arith.constant 15 : i32
    %85 = tpu.dynamic_rotate %43 by %c15_i32_47 dim 0 : vector<16x128xf32>, i32 -> vector<16x128xf32>
    %86 = vector.broadcast %7 : vector<1x128xf32> to vector<16x128xf32>
    %87 = arith.mulf %85, %86 : vector<16x128xf32>
    %cst_48 = arith.constant 0.000000e+00 : f32
    %88 = vector.shape_cast %25 : vector<16x1xi1> to vector<16x1xi1>
    %89 = vector.broadcast %88 : vector<16x1xi1> to vector<16x128xi1>
    %90 = vector.broadcast %cst_48 : f32 to vector<16x128xf32>
    %91 = arith.select %89, %87, %90 : vector<16x128xi1>, vector<16x128xf32>
    %c15_i32_49 = arith.constant 15 : i32
    %92 = tpu.dynamic_rotate %43 by %c15_i32_49 dim 0 : vector<16x128xf32>, i32 -> vector<16x128xf32>
    %c120_i32_50 = arith.constant 120 : i32
    %93 = tpu.dynamic_rotate %92 by %c120_i32_50 dim 1 : vector<16x128xf32>, i32 -> vector<16x128xf32>
    %94 = vector.broadcast %8 : vector<1x128xf32> to vector<16x128xf32>
    %95 = arith.mulf %93, %94 : vector<16x128xf32>
    %cst_51 = arith.constant 0.000000e+00 : f32
    %96 = vector.broadcast %cst_51 : f32 to vector<16x128xf32>
    %97 = arith.select %41, %95, %96 : vector<16x128xi1>, vector<16x128xf32>
    %98 = vector.broadcast %18 : vector<1x128xf32> to vector<16x128xf32>
    %99 = arith.addf %49, %98 : vector<16x128xf32>
    %100 = arith.addf %99, %62 : vector<16x128xf32>
    %101 = arith.addf %56, %69 : vector<16x128xf32>
    %102 = arith.addf %100, %71 : vector<16x128xf32>
    %103 = arith.addf %101, %78 : vector<16x128xf32>
    %104 = arith.addf %102, %84 : vector<16x128xf32>
    %105 = arith.addf %103, %91 : vector<16x128xf32>
    %106 = arith.addf %104, %97 : vector<16x128xf32>
    %107 = arith.addf %106, %105 : vector<16x128xf32>
    %cst_52 = arith.constant 0.000000e+00 : f32
    %108 = vector.broadcast %cst_52 : f32 to vector<16x128xf32>
    %109 = arith.maximumf %107, %108 : vector<16x128xf32>
    %c1_i32_53 = arith.constant 1 : i32
    %110 = tpu.dynamic_rotate %109 by %c1_i32_53 dim 0 : vector<16x128xf32>, i32 -> vector<16x128xf32>
    %c8_i32_54 = arith.constant 8 : i32
    %111 = tpu.dynamic_rotate %110 by %c8_i32_54 dim 1 : vector<16x128xf32>, i32 -> vector<16x128xf32>
    %112 = vector.broadcast %9 : vector<1x128xf32> to vector<16x128xf32>
    %113 = arith.mulf %111, %112 : vector<16x128xf32>
    %cst_55 = arith.constant 0.000000e+00 : f32
    %114 = vector.broadcast %cst_55 : f32 to vector<16x128xf32>
    %115 = arith.select %32, %113, %114 : vector<16x128xi1>, vector<16x128xf32>
    %c1_i32_56 = arith.constant 1 : i32
    %116 = tpu.dynamic_rotate %109 by %c1_i32_56 dim 0 : vector<16x128xf32>, i32 -> vector<16x128xf32>
    %117 = vector.broadcast %10 : vector<1x128xf32> to vector<16x128xf32>
    %118 = arith.mulf %116, %117 : vector<16x128xf32>
    %cst_57 = arith.constant 0.000000e+00 : f32
    %119 = vector.shape_cast %23 : vector<16x1xi1> to vector<16x1xi1>
    %120 = vector.broadcast %119 : vector<16x1xi1> to vector<16x128xi1>
    %121 = vector.broadcast %cst_57 : f32 to vector<16x128xf32>
    %122 = arith.select %120, %118, %121 : vector<16x128xi1>, vector<16x128xf32>
    %c1_i32_58 = arith.constant 1 : i32
    %123 = tpu.dynamic_rotate %109 by %c1_i32_58 dim 0 : vector<16x128xf32>, i32 -> vector<16x128xf32>
    %c120_i32_59 = arith.constant 120 : i32
    %124 = tpu.dynamic_rotate %123 by %c120_i32_59 dim 1 : vector<16x128xf32>, i32 -> vector<16x128xf32>
    %125 = vector.broadcast %11 : vector<1x128xf32> to vector<16x128xf32>
    %126 = arith.mulf %124, %125 : vector<16x128xf32>
    %cst_60 = arith.constant 0.000000e+00 : f32
    %127 = vector.broadcast %cst_60 : f32 to vector<16x128xf32>
    %128 = arith.select %35, %126, %127 : vector<16x128xi1>, vector<16x128xf32>
    %c8_i32_61 = arith.constant 8 : i32
    %129 = tpu.dynamic_rotate %109 by %c8_i32_61 dim 1 : vector<16x128xf32>, i32 -> vector<16x128xf32>
    %130 = vector.broadcast %12 : vector<1x128xf32> to vector<16x128xf32>
    %131 = arith.mulf %129, %130 : vector<16x128xf32>
    %cst_62 = arith.constant 0.000000e+00 : f32
    %132 = vector.shape_cast %27 : vector<1x128xi1> to vector<1x128xi1>
    %133 = vector.broadcast %132 : vector<1x128xi1> to vector<16x128xi1>
    %134 = vector.broadcast %cst_62 : f32 to vector<16x128xf32>
    %135 = arith.select %133, %131, %134 : vector<16x128xi1>, vector<16x128xf32>
    %136 = vector.broadcast %13 : vector<1x128xf32> to vector<16x128xf32>
    %137 = arith.mulf %109, %136 : vector<16x128xf32>
    %c120_i32_63 = arith.constant 120 : i32
    %138 = tpu.dynamic_rotate %109 by %c120_i32_63 dim 1 : vector<16x128xf32>, i32 -> vector<16x128xf32>
    %139 = vector.broadcast %14 : vector<1x128xf32> to vector<16x128xf32>
    %140 = arith.mulf %138, %139 : vector<16x128xf32>
    %cst_64 = arith.constant 0.000000e+00 : f32
    %141 = vector.shape_cast %29 : vector<1x128xi1> to vector<1x128xi1>
    %142 = vector.broadcast %141 : vector<1x128xi1> to vector<16x128xi1>
    %143 = vector.broadcast %cst_64 : f32 to vector<16x128xf32>
    %144 = arith.select %142, %140, %143 : vector<16x128xi1>, vector<16x128xf32>
    %c15_i32_65 = arith.constant 15 : i32
    %145 = tpu.dynamic_rotate %109 by %c15_i32_65 dim 0 : vector<16x128xf32>, i32 -> vector<16x128xf32>
    %c8_i32_66 = arith.constant 8 : i32
    %146 = tpu.dynamic_rotate %145 by %c8_i32_66 dim 1 : vector<16x128xf32>, i32 -> vector<16x128xf32>
    %147 = vector.broadcast %15 : vector<1x128xf32> to vector<16x128xf32>
    %148 = arith.mulf %146, %147 : vector<16x128xf32>
    %cst_67 = arith.constant 0.000000e+00 : f32
    %149 = vector.broadcast %cst_67 : f32 to vector<16x128xf32>
    %150 = arith.select %38, %148, %149 : vector<16x128xi1>, vector<16x128xf32>
    %c15_i32_68 = arith.constant 15 : i32
    %151 = tpu.dynamic_rotate %109 by %c15_i32_68 dim 0 : vector<16x128xf32>, i32 -> vector<16x128xf32>
    %152 = vector.broadcast %16 : vector<1x128xf32> to vector<16x128xf32>
    %153 = arith.mulf %151, %152 : vector<16x128xf32>
    %cst_69 = arith.constant 0.000000e+00 : f32
    %154 = vector.shape_cast %25 : vector<16x1xi1> to vector<16x1xi1>
    %155 = vector.broadcast %154 : vector<16x1xi1> to vector<16x128xi1>
    %156 = vector.broadcast %cst_69 : f32 to vector<16x128xf32>
    %157 = arith.select %155, %153, %156 : vector<16x128xi1>, vector<16x128xf32>
    %c15_i32_70 = arith.constant 15 : i32
    %158 = tpu.dynamic_rotate %109 by %c15_i32_70 dim 0 : vector<16x128xf32>, i32 -> vector<16x128xf32>
    %c120_i32_71 = arith.constant 120 : i32
    %159 = tpu.dynamic_rotate %158 by %c120_i32_71 dim 1 : vector<16x128xf32>, i32 -> vector<16x128xf32>
    %160 = vector.broadcast %17 : vector<1x128xf32> to vector<16x128xf32>
    %161 = arith.mulf %159, %160 : vector<16x128xf32>
    %cst_72 = arith.constant 0.000000e+00 : f32
    %162 = vector.broadcast %cst_72 : f32 to vector<16x128xf32>
    %163 = arith.select %41, %161, %162 : vector<16x128xi1>, vector<16x128xf32>
    %164 = vector.broadcast %19 : vector<1x128xf32> to vector<16x128xf32>
    %165 = arith.addf %115, %164 : vector<16x128xf32>
    %166 = arith.addf %165, %128 : vector<16x128xf32>
    %167 = arith.addf %122, %135 : vector<16x128xf32>
    %168 = arith.addf %166, %137 : vector<16x128xf32>
    %169 = arith.addf %167, %144 : vector<16x128xf32>
    %170 = arith.addf %168, %150 : vector<16x128xf32>
    %171 = arith.addf %169, %157 : vector<16x128xf32>
    %172 = arith.addf %170, %163 : vector<16x128xf32>
    %173 = arith.addf %172, %171 : vector<16x128xf32>
    %174 = arith.addf %173, %43 : vector<16x128xf32>
    %cst_73 = arith.constant 0.000000e+00 : f32
    %175 = vector.broadcast %cst_73 : f32 to vector<16x128xf32>
    %176 = arith.maximumf %174, %175 : vector<16x128xf32>
    %c0_74 = arith.constant 0 : index
    %c0_75 = arith.constant 0 : index
    %c0_76 = arith.constant 0 : index
    %177 = vector.load %arg6[%c0_74, %c0_75, %c0_76] : memref<2x16x128xf32, #tpu.memory_space<vmem>>, vector<1x16x128xf32>
    %178 = vector.shape_cast %177 : vector<1x16x128xf32> to vector<16x128xf32>
    %179 = vector.shape_cast %176 : vector<16x128xf32> to vector<1x16x128xf32>
    tpu.vector_store %arg6[%c0_74, %c0_75, %c0_76], %179 {strides = array<i32>} : memref<2x16x128xf32, #tpu.memory_space<vmem>>, vector<1x16x128xf32>,
    %c1_77 = arith.constant 1 : index
    %c0_78 = arith.constant 0 : index
    %c0_79 = arith.constant 0 : index
    %180 = vector.load %arg1[%c1_77, %c0_78, %c0_79] : memref<2x16x128xf32, #tpu.memory_space<vmem>>, vector<1x16x128xf32>
    %181 = vector.shape_cast %180 : vector<1x16x128xf32> to vector<16x128xf32>
    %c1_i32_80 = arith.constant 1 : i32
    %182 = tpu.dynamic_rotate %181 by %c1_i32_80 dim 0 : vector<16x128xf32>, i32 -> vector<16x128xf32>
    %c8_i32_81 = arith.constant 8 : i32
    %183 = tpu.dynamic_rotate %182 by %c8_i32_81 dim 1 : vector<16x128xf32>, i32 -> vector<16x128xf32>
    %184 = vector.broadcast %0 : vector<1x128xf32> to vector<16x128xf32>
    %185 = arith.mulf %183, %184 : vector<16x128xf32>
    %cst_82 = arith.constant 0.000000e+00 : f32
    %186 = vector.broadcast %cst_82 : f32 to vector<16x128xf32>
    %187 = arith.select %32, %185, %186 : vector<16x128xi1>, vector<16x128xf32>
    %c1_i32_83 = arith.constant 1 : i32
    %188 = tpu.dynamic_rotate %181 by %c1_i32_83 dim 0 : vector<16x128xf32>, i32 -> vector<16x128xf32>
    %189 = vector.broadcast %1 : vector<1x128xf32> to vector<16x128xf32>
    %190 = arith.mulf %188, %189 : vector<16x128xf32>
    %cst_84 = arith.constant 0.000000e+00 : f32
    %191 = vector.shape_cast %23 : vector<16x1xi1> to vector<16x1xi1>
    %192 = vector.broadcast %191 : vector<16x1xi1> to vector<16x128xi1>
    %193 = vector.broadcast %cst_84 : f32 to vector<16x128xf32>
    %194 = arith.select %192, %190, %193 : vector<16x128xi1>, vector<16x128xf32>
    %c1_i32_85 = arith.constant 1 : i32
    %195 = tpu.dynamic_rotate %181 by %c1_i32_85 dim 0 : vector<16x128xf32>, i32 -> vector<16x128xf32>
    %c120_i32_86 = arith.constant 120 : i32
    %196 = tpu.dynamic_rotate %195 by %c120_i32_86 dim 1 : vector<16x128xf32>, i32 -> vector<16x128xf32>
    %197 = vector.broadcast %2 : vector<1x128xf32> to vector<16x128xf32>
    %198 = arith.mulf %196, %197 : vector<16x128xf32>
    %cst_87 = arith.constant 0.000000e+00 : f32
    %199 = vector.broadcast %cst_87 : f32 to vector<16x128xf32>
    %200 = arith.select %35, %198, %199 : vector<16x128xi1>, vector<16x128xf32>
    %c8_i32_88 = arith.constant 8 : i32
    %201 = tpu.dynamic_rotate %181 by %c8_i32_88 dim 1 : vector<16x128xf32>, i32 -> vector<16x128xf32>
    %202 = vector.broadcast %3 : vector<1x128xf32> to vector<16x128xf32>
    %203 = arith.mulf %201, %202 : vector<16x128xf32>
    %cst_89 = arith.constant 0.000000e+00 : f32
    %204 = vector.shape_cast %27 : vector<1x128xi1> to vector<1x128xi1>
    %205 = vector.broadcast %204 : vector<1x128xi1> to vector<16x128xi1>
    %206 = vector.broadcast %cst_89 : f32 to vector<16x128xf32>
    %207 = arith.select %205, %203, %206 : vector<16x128xi1>, vector<16x128xf32>
    %208 = vector.broadcast %4 : vector<1x128xf32> to vector<16x128xf32>
    %209 = arith.mulf %181, %208 : vector<16x128xf32>
    %c120_i32_90 = arith.constant 120 : i32
    %210 = tpu.dynamic_rotate %181 by %c120_i32_90 dim 1 : vector<16x128xf32>, i32 -> vector<16x128xf32>
    %211 = vector.broadcast %5 : vector<1x128xf32> to vector<16x128xf32>
    %212 = arith.mulf %210, %211 : vector<16x128xf32>
    %cst_91 = arith.constant 0.000000e+00 : f32
    %213 = vector.shape_cast %29 : vector<1x128xi1> to vector<1x128xi1>
    %214 = vector.broadcast %213 : vector<1x128xi1> to vector<16x128xi1>
    %215 = vector.broadcast %cst_91 : f32 to vector<16x128xf32>
    %216 = arith.select %214, %212, %215 : vector<16x128xi1>, vector<16x128xf32>
    %c15_i32_92 = arith.constant 15 : i32
    %217 = tpu.dynamic_rotate %181 by %c15_i32_92 dim 0 : vector<16x128xf32>, i32 -> vector<16x128xf32>
    %c8_i32_93 = arith.constant 8 : i32
    %218 = tpu.dynamic_rotate %217 by %c8_i32_93 dim 1 : vector<16x128xf32>, i32 -> vector<16x128xf32>
    %219 = vector.broadcast %6 : vector<1x128xf32> to vector<16x128xf32>
    %220 = arith.mulf %218, %219 : vector<16x128xf32>
    %cst_94 = arith.constant 0.000000e+00 : f32
    %221 = vector.broadcast %cst_94 : f32 to vector<16x128xf32>
    %222 = arith.select %38, %220, %221 : vector<16x128xi1>, vector<16x128xf32>
    %c15_i32_95 = arith.constant 15 : i32
    %223 = tpu.dynamic_rotate %181 by %c15_i32_95 dim 0 : vector<16x128xf32>, i32 -> vector<16x128xf32>
    %224 = vector.broadcast %7 : vector<1x128xf32> to vector<16x128xf32>
    %225 = arith.mulf %223, %224 : vector<16x128xf32>
    %cst_96 = arith.constant 0.000000e+00 : f32
    %226 = vector.shape_cast %25 : vector<16x1xi1> to vector<16x1xi1>
    %227 = vector.broadcast %226 : vector<16x1xi1> to vector<16x128xi1>
    %228 = vector.broadcast %cst_96 : f32 to vector<16x128xf32>
    %229 = arith.select %227, %225, %228 : vector<16x128xi1>, vector<16x128xf32>
    %c15_i32_97 = arith.constant 15 : i32
    %230 = tpu.dynamic_rotate %181 by %c15_i32_97 dim 0 : vector<16x128xf32>, i32 -> vector<16x128xf32>
    %c120_i32_98 = arith.constant 120 : i32
    %231 = tpu.dynamic_rotate %230 by %c120_i32_98 dim 1 : vector<16x128xf32>, i32 -> vector<16x128xf32>
    %232 = vector.broadcast %8 : vector<1x128xf32> to vector<16x128xf32>
    %233 = arith.mulf %231, %232 : vector<16x128xf32>
    %cst_99 = arith.constant 0.000000e+00 : f32
    %234 = vector.broadcast %cst_99 : f32 to vector<16x128xf32>
    %235 = arith.select %41, %233, %234 : vector<16x128xi1>, vector<16x128xf32>
    %236 = vector.broadcast %18 : vector<1x128xf32> to vector<16x128xf32>
    %237 = arith.addf %187, %236 : vector<16x128xf32>
    %238 = arith.addf %237, %200 : vector<16x128xf32>
    %239 = arith.addf %194, %207 : vector<16x128xf32>
    %240 = arith.addf %238, %209 : vector<16x128xf32>
    %241 = arith.addf %239, %216 : vector<16x128xf32>
    %242 = arith.addf %240, %222 : vector<16x128xf32>
    %243 = arith.addf %241, %229 : vector<16x128xf32>
    %244 = arith.addf %242, %235 : vector<16x128xf32>
    %245 = arith.addf %244, %243 : vector<16x128xf32>
    %cst_100 = arith.constant 0.000000e+00 : f32
    %246 = vector.broadcast %cst_100 : f32 to vector<16x128xf32>
    %247 = arith.maximumf %245, %246 : vector<16x128xf32>
    %c1_i32_101 = arith.constant 1 : i32
    %248 = tpu.dynamic_rotate %247 by %c1_i32_101 dim 0 : vector<16x128xf32>, i32 -> vector<16x128xf32>
    %c8_i32_102 = arith.constant 8 : i32
    %249 = tpu.dynamic_rotate %248 by %c8_i32_102 dim 1 : vector<16x128xf32>, i32 -> vector<16x128xf32>
    %250 = vector.broadcast %9 : vector<1x128xf32> to vector<16x128xf32>
    %251 = arith.mulf %249, %250 : vector<16x128xf32>
    %cst_103 = arith.constant 0.000000e+00 : f32
    %252 = vector.broadcast %cst_103 : f32 to vector<16x128xf32>
    %253 = arith.select %32, %251, %252 : vector<16x128xi1>, vector<16x128xf32>
    %c1_i32_104 = arith.constant 1 : i32
    %254 = tpu.dynamic_rotate %247 by %c1_i32_104 dim 0 : vector<16x128xf32>, i32 -> vector<16x128xf32>
    %255 = vector.broadcast %10 : vector<1x128xf32> to vector<16x128xf32>
    %256 = arith.mulf %254, %255 : vector<16x128xf32>
    %cst_105 = arith.constant 0.000000e+00 : f32
    %257 = vector.shape_cast %23 : vector<16x1xi1> to vector<16x1xi1>
    %258 = vector.broadcast %257 : vector<16x1xi1> to vector<16x128xi1>
    %259 = vector.broadcast %cst_105 : f32 to vector<16x128xf32>
    %260 = arith.select %258, %256, %259 : vector<16x128xi1>, vector<16x128xf32>
    %c1_i32_106 = arith.constant 1 : i32
    %261 = tpu.dynamic_rotate %247 by %c1_i32_106 dim 0 : vector<16x128xf32>, i32 -> vector<16x128xf32>
    %c120_i32_107 = arith.constant 120 : i32
    %262 = tpu.dynamic_rotate %261 by %c120_i32_107 dim 1 : vector<16x128xf32>, i32 -> vector<16x128xf32>
    %263 = vector.broadcast %11 : vector<1x128xf32> to vector<16x128xf32>
    %264 = arith.mulf %262, %263 : vector<16x128xf32>
    %cst_108 = arith.constant 0.000000e+00 : f32
    %265 = vector.broadcast %cst_108 : f32 to vector<16x128xf32>
    %266 = arith.select %35, %264, %265 : vector<16x128xi1>, vector<16x128xf32>
    %c8_i32_109 = arith.constant 8 : i32
    %267 = tpu.dynamic_rotate %247 by %c8_i32_109 dim 1 : vector<16x128xf32>, i32 -> vector<16x128xf32>
    %268 = vector.broadcast %12 : vector<1x128xf32> to vector<16x128xf32>
    %269 = arith.mulf %267, %268 : vector<16x128xf32>
    %cst_110 = arith.constant 0.000000e+00 : f32
    %270 = vector.shape_cast %27 : vector<1x128xi1> to vector<1x128xi1>
    %271 = vector.broadcast %270 : vector<1x128xi1> to vector<16x128xi1>
    %272 = vector.broadcast %cst_110 : f32 to vector<16x128xf32>
    %273 = arith.select %271, %269, %272 : vector<16x128xi1>, vector<16x128xf32>
    %274 = vector.broadcast %13 : vector<1x128xf32> to vector<16x128xf32>
    %275 = arith.mulf %247, %274 : vector<16x128xf32>
    %c120_i32_111 = arith.constant 120 : i32
    %276 = tpu.dynamic_rotate %247 by %c120_i32_111 dim 1 : vector<16x128xf32>, i32 -> vector<16x128xf32>
    %277 = vector.broadcast %14 : vector<1x128xf32> to vector<16x128xf32>
    %278 = arith.mulf %276, %277 : vector<16x128xf32>
    %cst_112 = arith.constant 0.000000e+00 : f32
    %279 = vector.shape_cast %29 : vector<1x128xi1> to vector<1x128xi1>
    %280 = vector.broadcast %279 : vector<1x128xi1> to vector<16x128xi1>
    %281 = vector.broadcast %cst_112 : f32 to vector<16x128xf32>
    %282 = arith.select %280, %278, %281 : vector<16x128xi1>, vector<16x128xf32>
    %c15_i32_113 = arith.constant 15 : i32
    %283 = tpu.dynamic_rotate %247 by %c15_i32_113 dim 0 : vector<16x128xf32>, i32 -> vector<16x128xf32>
    %c8_i32_114 = arith.constant 8 : i32
    %284 = tpu.dynamic_rotate %283 by %c8_i32_114 dim 1 : vector<16x128xf32>, i32 -> vector<16x128xf32>
    %285 = vector.broadcast %15 : vector<1x128xf32> to vector<16x128xf32>
    %286 = arith.mulf %284, %285 : vector<16x128xf32>
    %cst_115 = arith.constant 0.000000e+00 : f32
    %287 = vector.broadcast %cst_115 : f32 to vector<16x128xf32>
    %288 = arith.select %38, %286, %287 : vector<16x128xi1>, vector<16x128xf32>
    %c15_i32_116 = arith.constant 15 : i32
    %289 = tpu.dynamic_rotate %247 by %c15_i32_116 dim 0 : vector<16x128xf32>, i32 -> vector<16x128xf32>
    %290 = vector.broadcast %16 : vector<1x128xf32> to vector<16x128xf32>
    %291 = arith.mulf %289, %290 : vector<16x128xf32>
    %cst_117 = arith.constant 0.000000e+00 : f32
    %292 = vector.shape_cast %25 : vector<16x1xi1> to vector<16x1xi1>
    %293 = vector.broadcast %292 : vector<16x1xi1> to vector<16x128xi1>
    %294 = vector.broadcast %cst_117 : f32 to vector<16x128xf32>
    %295 = arith.select %293, %291, %294 : vector<16x128xi1>, vector<16x128xf32>
    %c15_i32_118 = arith.constant 15 : i32
    %296 = tpu.dynamic_rotate %247 by %c15_i32_118 dim 0 : vector<16x128xf32>, i32 -> vector<16x128xf32>
    %c120_i32_119 = arith.constant 120 : i32
    %297 = tpu.dynamic_rotate %296 by %c120_i32_119 dim 1 : vector<16x128xf32>, i32 -> vector<16x128xf32>
    %298 = vector.broadcast %17 : vector<1x128xf32> to vector<16x128xf32>
    %299 = arith.mulf %297, %298 : vector<16x128xf32>
    %cst_120 = arith.constant 0.000000e+00 : f32
    %300 = vector.broadcast %cst_120 : f32 to vector<16x128xf32>
    %301 = arith.select %41, %299, %300 : vector<16x128xi1>, vector<16x128xf32>
    %302 = vector.broadcast %19 : vector<1x128xf32> to vector<16x128xf32>
    %303 = arith.addf %253, %302 : vector<16x128xf32>
    %304 = arith.addf %303, %266 : vector<16x128xf32>
    %305 = arith.addf %260, %273 : vector<16x128xf32>
    %306 = arith.addf %304, %275 : vector<16x128xf32>
    %307 = arith.addf %305, %282 : vector<16x128xf32>
    %308 = arith.addf %306, %288 : vector<16x128xf32>
    %309 = arith.addf %307, %295 : vector<16x128xf32>
    %310 = arith.addf %308, %301 : vector<16x128xf32>
    %311 = arith.addf %310, %309 : vector<16x128xf32>
    %312 = arith.addf %311, %181 : vector<16x128xf32>
    %cst_121 = arith.constant 0.000000e+00 : f32
    %313 = vector.broadcast %cst_121 : f32 to vector<16x128xf32>
    %314 = arith.maximumf %312, %313 : vector<16x128xf32>
    %c1_122 = arith.constant 1 : index
    %c0_123 = arith.constant 0 : index
    %c0_124 = arith.constant 0 : index
    %315 = vector.load %arg6[%c1_122, %c0_123, %c0_124] : memref<2x16x128xf32, #tpu.memory_space<vmem>>, vector<1x16x128xf32>
    %316 = vector.shape_cast %315 : vector<1x16x128xf32> to vector<16x128xf32>
    %317 = vector.shape_cast %314 : vector<16x128xf32> to vector<1x16x128xf32>
    tpu.vector_store %arg6[%c1_122, %c0_123, %c0_124], %317 {strides = array<i32>} : memref<2x16x128xf32, #tpu.memory_space<vmem>>, vector<1x16x128xf32>,
    return
  }
  func.func @transform_0(%arg0: i32) -> (i32, i32, i32) {
    %c0_i32 = arith.constant 0 : i32
    %c0_i32_0 = arith.constant 0 : i32
    %c0_i32_1 = arith.constant 0 : i32
    return %arg0, %c0_i32, %c0_i32_0 : i32, i32, i32
  }
  func.func @transform_1(%arg0: i32) -> (i32, i32) {
    %c0_i32 = arith.constant 0 : i32
    %c0_i32_0 = arith.constant 0 : i32
    %c0_i32_1 = arith.constant 0 : i32
    return %c0_i32, %c0_i32_0 : i32, i32
  }
  func.func @transform_2(%arg0: i32) -> (i32, i32) {
    %c0_i32 = arith.constant 0 : i32
    %c0_i32_0 = arith.constant 0 : i32
    %c0_i32_1 = arith.constant 0 : i32
    return %c0_i32, %c0_i32_0 : i32, i32
  }
  func.func @transform_3(%arg0: i32) -> (i32, i32) {
    %c0_i32 = arith.constant 0 : i32
    %c0_i32_0 = arith.constant 0 : i32
    %c0_i32_1 = arith.constant 0 : i32
    return %c0_i32, %c0_i32_0 : i32, i32
  }
  func.func @transform_4(%arg0: i32) -> (i32, i32) {
    %c0_i32 = arith.constant 0 : i32
    %c0_i32_0 = arith.constant 0 : i32
    %c0_i32_1 = arith.constant 0 : i32
    return %c0_i32, %c0_i32_0 : i32, i32
  }
  func.func @transform_5(%arg0: i32) -> (i32, i32, i32) {
    %c0_i32 = arith.constant 0 : i32
    %c0_i32_0 = arith.constant 0 : i32
    %c0_i32_1 = arith.constant 0 : i32
    return %arg0, %c0_i32, %c0_i32_0 : i32, i32, i32
  }
}

</mosaic_0001>

<bundles_post_ra>
// kernel: tpu_custom_call.1
= control target key start
LH: loop header
LB: loop body
LE: loop exit
PB: predicated region body
PF: predicated region fallthrough
CT: control target
= control target key end

     0   :  { %10 = vsyncpa [#allocation3], 0  ;;  %s1793_s0 = inlined_call_operand.hbm [shape: f32[4,16,128], index: 0, kind: input, shape index: {}]   ;;  %s1794_s1 = inlined_call_operand.hbm [shape: f32[9,128], index: 1, kind: input, shape index: {}]   ;;  %s1795_s2 = inlined_call_operand.vmem [shape: f32[1,128], index: 2, kind: input, shape index: {}]   ;;  %s1796_s3 = inlined_call_operand.hbm [shape: f32[9,128], index: 3, kind: input, shape index: {}]   ;;  %s1797_s4 = inlined_call_operand.vmem [shape: f32[1,128], index: 4, kind: input, shape index: {}]   ;;  %s1798_s5 = inlined_call_operand.hbm [shape: f32[4,16,128], index: 5, kind: output, shape index: {}]  }
   0x1   :  { %12 = vsyncpa [#allocation3 + $0x1], 0 }
   0x2   :  { %13 = vsyncpa [#allocation6], 0 }
   0x3   :  { %14 = vsyncpa [#allocation4], 0 }
   0x4   :  { %16 = vsyncpa [#allocation4 + $0x1], 0  ;;  %s1194_s18 = smov 0   ;;  %s1196_s19 = smov 0  }
   0x5   :  { %s1198_s20 = smov 0   ;;  %s1200_s21 = smov 0  }
   0x6 LB: > { %s1215_s22 = sadd.s32 4294967295, %s1153_s21   ;;  %s877_s23 = sadd.s32 4294967294, %s1153_s21   ;;  %s1153_s21 = sphi %s1200_s21, %s1826_s21   ;;  %s1149_s20 = sphi %s1198_s20, %s1825_s20   ;;  %s1145_s19 = sphi %s1196_s19, %s1824_s19   ;;  %s1141_s18 = sphi %s1194_s18, %s1823_s18  }
   0x7   : > { %p42_p0 = scmp.ne.s32.totalorder %s1145_s19, %s1141_s18  ;;  %p1799_p1 = scmp.eq.s32.totalorder %s1215_s22, 0 }
   0x8   : > { %p156_p3 = scmp.eq.s32.totalorder %s877_s23, 1  ;;  %p878_p5 = scmp.ge.s32.totalorder %s1153_s21, 1 }
   0x9   : > { %p1224_p4 = por %p1799_p1, %p42_p0  ;;  %p163_p7 = scmp.lt.s32.totalorder %s1153_s21, 3 }
   0xa   : > { %p1229_p6 = por %p156_p3, %p42_p0  ;;  %s1155_s27 = smov [#allocation5]  }
   0xb   : > { %s1802_s24 = scalar_select %p1224_p4, 1, 0 }
   0xc   : > { %s1803_s25 = scalar_select %p1229_p6, 1, 0 }
   0xd   : > { %p1234_p8 = pnand %p878_p5, %p163_p7  ;;  %s175_s28 = sshll.u32 %s1155_s27, 4  ;;  %s1238_s28 = int_to_ptr.vmem [resolvable:$true] %s175_s28 }
   0xe   : > { %s1156_s30 = smov [#allocation7]   ;;  %s997_s9 = scalar_lea.hbm %s1794_s1, 256 }
   0xf   : > { %p937_p9 = pneg %p1234_p8  ;;  %s191_s6 = sshll.u32 %s1156_s30, 4  ;;  %s1249_s6 = int_to_ptr.vmem [resolvable:$true] %s191_s6 }
  0x10   : > { %p998_p12 = scmp.ne.s32.totalorder %s1794_s1, %s997_s9  ;;  %p1004_p5 = scmp.lt.u32.totalorder %s997_s9, %s1794_s1 }
  0x11   : > { %p1245_p11 = pnand %p937_p9, %p1799_p1 }
  0x13   : > { %p999_p13 = pneg %p1245_p11 }
  0x15   : > { %p1000_p0 = pnand %p999_p13, %p998_p12 }
  0x17   : > { %p1001_p3 = pneg %p1000_p0 }
  0x19   : > { %p1006_p7 = pnand %p1004_p5, %p1001_p3 }
  0x1b   : > { %1009 = shalt.err (!%p1006_p7)
}
  0x1c   : > { %s1010_s14 = scalar_lea.vmem %s1238_s28, 256  ;;  %p1018_p2 = scmp.lt.s32.totalorder %s1238_s28, %s1238_s28 }
  0x1d   : > { %p1011_p9 = scmp.ne.s32.totalorder %s1238_s28, %s1010_s14  ;;  %p1019_p12 = scmp.lt.s32.totalorder %s1010_s14, %s1010_s14 }
  0x1f   : > { %p1013_p10 = pnand %p1011_p9, %p999_p13  ;;  %p1020_p0 = por %p1019_p12, %p1018_p2 }
  0x21   : > { %p1014_p1 = pneg %p1013_p10 }
  0x23   : > { %p1021_p6 = pnand %p1020_p0, %p1014_p1 }
  0x25   : > { %1024 = shalt.err (!%p1021_p6)
}
  0x26   : > { %s1157_s15 = smov 128   ;;  %s1158_s16 = smov 8  }
  0x27   : > { %940 = dma.hbm_to_vmem [thread:$0]  (!%p1245_p11), %s1794_s1, 256, %s1238_s28, [#allocation6], %s1157_s15, %s1157_s15, %s1158_s16  }
  0x28   : > { %s1025_s7 = scalar_lea.hbm %s1796_s3, 256 }
  0x29   : > { %p1026_p1 = scmp.ne.s32.totalorder %s1796_s3, %s1025_s7  ;;  %p1032_p10 = scmp.lt.u32.totalorder %s1025_s7, %s1796_s3 }
  0x2b   : > { %p1028_p2 = pnand %p1026_p1, %p999_p13 }
  0x2d   : > { %p1029_p6 = pneg %p1028_p2 }
  0x2f   : > { %p1034_p3 = pnand %p1032_p10, %p1029_p6 }
  0x31   : > { %1037 = shalt.err (!%p1034_p3)
}
  0x32   : > { %s1038_s28 = scalar_lea.vmem %s1249_s6, 256  ;;  %p1046_p12 = scmp.lt.s32.totalorder %s1249_s6, %s1249_s6 }
  0x33   : > { %p1039_p5 = scmp.ne.s32.totalorder %s1249_s6, %s1038_s28  ;;  %p1047_p0 = scmp.lt.s32.totalorder %s1038_s28, %s1038_s28 }
  0x35   : > { %p1041_p7 = pnand %p1039_p5, %p999_p13  ;;  %p1048_p1 = por %p1047_p0, %p1046_p12 }
  0x37   : > { %p1042_p9 = pneg %p1041_p7 }
  0x39   : > { %p1049_p2 = pnand %p1048_p1, %p1042_p9 }
  0x3b   : > { %1052 = shalt.err (!%p1049_p2)
}
  0x3c   : > { %943 = dma.hbm_to_vmem [thread:$0]  (!%p1245_p11), %s1796_s3, 256, %s1249_s6, [#allocation6], %s1157_s15, %s1157_s15, %s1158_s16  }
  0x3d   : > { %s1310_s29 = sadd.s32 1, %s1153_s21   ;;  %s29_s14 = sadd.s32 1, %s1149_s20 }
  0x3e   : > { %s26_s17 = ssub.s32 %s1153_s21, %s1310_s29  ;;  %p36_p13 = scmp.ne.s32.totalorder %s1149_s20, %s1145_s19 }
  0x3f   : > { %p27_p6 = scmp.eq.s32.totalorder %s26_s17, 0  ;;  %p37_p10 = scmp.eq.s32.totalorder %s1153_s21, 0 }
  0x40   : > { %p1806_p3 = scmp.eq.s32.totalorder %s1215_s22, 1  ;;  %p954_p7 = scmp.lt.s32.totalorder %s1153_s21, 2 }
  0x41   : > { %s1326_s27 = scalar_select %p27_p6, %s1149_s20, %s29_s14  }
  0x42   : > { %p1320_p5 = por %p1806_p3, %p36_p13  ;;  %p38_p9 = por %p37_p10, %p36_p13 }
  0x43   : > { %s208_s30 = sand.u32 1, %s1149_s20   ;;  %s922_s6 = sshll.u32 %s1153_s21, 9 }
  0x44   : > { %s1807_s23 = scalar_select %p1320_p5, 1, 0 }
  0x45   : > { %s882_s7 = sshll.u32 %s208_s30, 5  ;;  %s1333_s10 = scalar_lea.hbm %s1793_s0, %s922_s6 }
  0x46   : > { %s212_s11 = scalar_lea.vmem [#allocation2], %s882_s7  ;;  %p1337_p11 = pnand %p954_p7, %p38_p9 }
  0x47   : > { %s220_s28 = sshll.u32 %s212_s11, 4  ;;  %s1341_s13 = scalar_lea.sflag [#allocation3], %s208_s30  ;;  %s1335_s28 = int_to_ptr.vmem [resolvable:$true] %s220_s28 }
  0x48   : > { %s1053_s14 = scalar_lea.hbm %s1333_s10, 512  ;;  %p1055_p0 = pneg %p1337_p11 }
  0x49   : > { %p1054_p12 = scmp.ne.s32.totalorder %s1333_s10, %s1053_s14  ;;  %s1058_s6 = scalar_lea.hbm %s1793_s0, 1024 }
  0x4a   : > { %p1059_p13 = scmp.lt.u32.totalorder %s1333_s10, %s1793_s0  ;;  %p1060_p6 = scmp.lt.u32.totalorder %s1058_s6, %s1053_s14 }
  0x4b   : > { %p1056_p1 = pnand %p1055_p0, %p1054_p12  ;;  %p1062_p3 = scmp.lt.u32.totalorder %s1053_s14, %s1333_s10 }
  0x4c   : > { %p1061_p10 = por %p1060_p6, %p1059_p13 }
  0x4d   : > { %p1057_p2 = pneg %p1056_p1 }
  0x4e   : > { %p1063_p7 = por %p1062_p3, %p1061_p10 }
  0x50   : > { %p1064_p9 = pnand %p1063_p7, %p1057_p2 }
  0x52   : > { %1067 = shalt.err (!%p1064_p9)
}
  0x53   : > { %s1068_s30 = scalar_lea.vmem %s1335_s28, 512  ;;  %s1159_s11 = smov [#allocation2]  }
  0x54   : > { %p1069_p12 = scmp.ne.s32.totalorder %s1335_s28, %s1068_s30  ;;  %s1073_s17 = sshll.u32 %s1159_s11, 4  ;;  %s1074_s17 = int_to_ptr.vmem [resolvable:$false] %s1073_s17 }
  0x55   : > { %s1075_s7 = scalar_lea.vmem %s1074_s17, 1024  ;;  %p1076_p4 = scmp.lt.s32.totalorder %s1335_s28, %s1074_s17 }
  0x56   : > { %p1071_p1 = pnand %p1069_p12, %p1055_p0  ;;  %p1077_p13 = scmp.lt.s32.totalorder %s1075_s7, %s1068_s30 }
  0x58   : > { %p1072_p5 = pneg %p1071_p1  ;;  %p1078_p6 = por %p1077_p13, %p1076_p4 }
  0x5a   : > { %p1079_p10 = pnand %p1078_p6, %p1072_p5 }
  0x5c   : > { %1082 = shalt.err (!%p1079_p10)
}
  0x5d   : > { %947 = dma.hbm_to_vmem [thread:$0]  (!%p1337_p11), %s1333_s10, 512, %s1335_s28, %s1341_s13, %s1157_s15, %s1157_s15, %s1158_s16  }
  0x5e   : > { %232 = sbr.rel (%p1234_p8) target bundleno = 460 (0x1cc), region = 40  ;;  %s1375_s14 = sand.u32 (!%p1234_p8), 1, %s1145_s19  }
  0x5f   : > { %s887_s6 = sshll.u32 (!%p1234_p8), %s1375_s14, 5  ;;  %s235_s8 = scalar_lea.sflag (!%p1234_p8), [#allocation3], %s1375_s14 }
  0x60   : > { %s238_s12 = scalar_lea.vmem (!%p1234_p8), [#allocation2], %s887_s6  ;;  %p1809_p4 = scmp.ne.s32.totalorder (!%p1234_p8), %s1802_s24, 0 }
  0x65   : > { %1128 = dma.done.wait (%p1809_p4), %s235_s8, 512  }
  0x66   : > { %1130 = vsyncadd (%p1809_p4), %s235_s8, 4294966784  ;;  %p1810_p5 = scmp.eq.s32.totalorder %s1215_s22, 0 }
  0x68   : > { %1132 = dma.done.wait (%p1810_p5), [#allocation6], 512   ;;  %p1811_p8 = pmov %p1810_p5 }
  0x69   : > { %v295_v0 = vlaneseq  ;;  %v1392_v2 = vld [vmem:[%s238_s12 + $0x10] sm:$0xff]  ;;  %v1394_v3 = vld [vmem:[%s238_s12 + $0x18] sm:$0xff]  ;;  %v1398_v6 = vld [vmem:[%s238_s12] sm:$0xff]  ;;  %s1160_s24 = smov 8   ;;  %s1161_s26 = smov 120  }
  0x6a   : > { %1134 = vsyncadd (%p1811_p8), [#allocation6], 4294966784  ;;  %v593_v4 = vrot.slane %v1392_v2, 7  ;;  %v594_v5 = vrot.slane %v1394_v3, 7  ;;  %v1400_v7 = vld [vmem:[%s238_s12 + $0x8] sm:$0xff]  ;;  %v328_v8 = vrot.slane %v1398_v6, 7 }
  0x6b   : > { %v1389_v1 = vshrl.u32 %v295_v0, 7  ;;  %v329_v9 = vrot.slane %v1400_v7, 7  ;;  %v395_v14 = vrot.slane %v1398_v6, 1  ;;  %v396_v15 = vrot.slane %v1400_v7, 1  ;;  %v894_v31 = vld [vmem:[#allocation5 + $0x3] ss:$0 sm:$0xff] }
  0x6c   : > { %v635_v18 = vrot.slane %v1392_v2, 1  ;;  %v636_v19 = vrot.slane %v1394_v3, 1  ;;  %v892_v32 = vld [vmem:[#allocation5 + $0x1] ss:$0 sm:$0xff]  ;;  %v1471_v34 = vand.u32 127, %v295_v0  ;;  %s924_s13 = sshll.u32 %s1215_s22, 9 }
  0x6d   : > { %vm330_vm0 = vcmp.lt.s32.totalorder %v1389_v1, 1  ;;  %vm397_vm1 = vcmp.lt.s32.totalorder %v1389_v1, 7  ;;  %v1474_v37 = vadd.s32 8, %v1389_v1  ;;  %v898_v38 = vld [vmem:[#allocation5 + $0x7] ss:$0 sm:$0xff]  ;;  %vm300_vm4 = vcmp.ge.s32.totalorder %v1389_v1, 1  ;;  %s1746_s7 = scalar_lea.hbm %s1798_s5, %s924_s13 }
  0x6e   : > { %v1406_v10 = vsel %vm330_vm0, %v594_v5, %v593_v4  ;;  %v332_v11 = vsel %vm330_vm0, %v329_v9, %v328_v8  ;;  %v1415_v12 = vsel %vm330_vm0, %v593_v4, %v594_v5  ;;  %v331_v13 = vsel %vm330_vm0, %v328_v8, %v329_v9  ;;  %v891_v43 = vld [vmem:[#allocation5] ss:$0 sm:$0xff]  ;;  %v896_v44 = vld [vmem:[#allocation5 + $0x5] ss:$0 sm:$0xff]  ;;  %v893_v59 = vld [vmem:[#allocation5 + $0x2] ss:$0 sm:$0xff] }
  0x6f   : > { %597 = vrot.lane.b32.xlu1 %v1406_v10, %s1160_s24  ;;  %333 = vrot.lane.b32.xlu0 %v332_v11, %s1160_s24  ;;  %v399_v16 = vsel %vm397_vm1, %v396_v15, %v395_v14  ;;  %v398_v17 = vsel %vm397_vm1, %v395_v14, %v396_v15  ;;  %v638_v20 = vsel %vm397_vm1, %v636_v19, %v635_v18  ;;  %vm304_vm2 = vcmp.ge.s32.totalorder %v1471_v34, 8  ;;  %v1500_v5 = vld [vmem:[#allocation5 + $0x4] ss:$0 sm:$0xff]  ;;  %v900_v14 = vld [vmem:[%s1795_s2] ss:$0 sm:$0xff]  ;;  %s272_s9 = scalar_lea.vmem [#allocation8], %s887_s6 }
  0x70   : > { %v637_v21 = vsel %vm397_vm1, %v635_v18, %v636_v19  ;;  %v349_v36 = vmul.f32 %v892_v32, %v332_v11  ;;  %v350_v42 = vmul.f32 %v892_v32, %v331_v13  ;;  %vm305_vm3 = vcmp.lt.s32.totalorder %v1471_v34, 120  ;;  %vm1492_vm6 = vmand %vm300_vm4, %vm304_vm2  ;;  %s785_s30 = sshll.u32 %s272_s9, 4  ;;  %s771_s22 = scalar_lea.sflag [#allocation4], %s1375_s14  ;;  %s1748_s30 = int_to_ptr.vmem [resolvable:$true] %s785_s30 }
  0x71   : > { %v417_v45 = vmul.f32 %v898_v38, %v399_v16  ;;  %v605_v47 = vmul.f32 %v892_v32, %v1406_v10  ;;  %vm303_vm5 = vcmp.le.s32.totalorder %v1474_v37, 14  ;;  %v606_v51 = vmul.f32 %v892_v32, %v1415_v12  ;;  %vm1522_vm7 = vmand %vm300_vm4, %vm305_vm3  ;;  %v910_v37 = vld [vmem:[%s1797_s4] ss:$0 sm:$0xff]  ;;  %s1083_s6 = scalar_lea.vmem %s1748_s30, 512  ;;  %p1820_p0 = scmp.ne.s32.totalorder %s1807_s23, 0 }
  0x72   : > { %v351_v48 = vsel %vm300_vm4, %v349_v36, 0.0  ;;  %v416_v52 = vmul.f32 %v898_v38, %v398_v17  ;;  %v648_v56 = vmul.f32 %v898_v38, %v638_v20  ;;  %vm1550_vm8 = vmand %vm303_vm5, %vm304_vm2  ;;  %p1084_p11 = scmp.ne.s32.totalorder %s1748_s30, %s1083_s6  ;;  %s1162_s8 = smov [#allocation8]  }
  0x73   : > { %599 = vrot.lane.b32.xlu1 %v1415_v12, %s1160_s24  ;;  %335 = vrot.lane.b32.xlu0 %v331_v13, %s1160_s24  ;;  %v419_v62 = vsel %vm303_vm5, %v417_v45, 0.0  ;;  %vm1572_vm9 = vmand %vm303_vm5, %vm305_vm3  ;;  %s1087_s12 = sshll.u32 %s1162_s8, 4  ;;  %s1088_s12 = int_to_ptr.vmem [resolvable:$false] %s1087_s12 }
  0x74   : > { %p1085_p2 = pnand %p1084_p11, %p1820_p0  ;;  %p1090_p7 = scmp.lt.s32.totalorder %s1748_s30, %s1088_s12 }
  0x76   : > { %p1086_p3 = pneg %p1085_p2 }
  0x77   : > { %355 = vrot.lane.b32.xlu1 %v331_v13, %s1161_s26  ;;  %353 = vrot.lane.b32.xlu0 %v332_v11, %s1161_s26  ;;  %v647_v13 = vmul.f32 %v898_v38, %v637_v21 }
  0x7b   : > { %611 = vrot.lane.b32.xlu1 %v1415_v12, %s1161_s26  ;;  %609 = vrot.lane.b32.xlu0 %v1406_v10, %s1161_s26 }
  0x7f   : > { %367 = vrot.lane.b32.xlu1 %v1400_v7, %s1160_s24  ;;  %365 = vrot.lane.b32.xlu0 %v1398_v6, %s1160_s24 }
  0x83   : > { %619 = vrot.lane.b32.xlu1 %v1394_v3, %s1160_s24  ;;  %617 = vrot.lane.b32.xlu0 %v1392_v2, %s1160_s24 }
  0x87   : > { %385 = vrot.lane.b32.xlu1 %v1400_v7, %s1161_s26  ;;  %383 = vrot.lane.b32.xlu0 %v1398_v6, %s1161_s26 }
  0x8b   : > { %402 = vrot.lane.b32.xlu1 %v399_v16, %s1160_s24  ;;  %400 = vrot.lane.b32.xlu0 %v398_v17, %s1160_s24 }
  0x8f   : > { %629 = vrot.lane.b32.xlu1 %v1394_v3, %s1161_s26  ;;  %627 = vrot.lane.b32.xlu0 %v1392_v2, %s1161_s26 }
  0x93   : > { %641 = vrot.lane.b32.xlu1 %v638_v20, %s1160_s24  ;;  %639 = vrot.lane.b32.xlu0 %v637_v21, %s1160_s24 }
  0x97   : > { %422 = vrot.lane.b32.xlu1 %v399_v16, %s1161_s26  ;;  %420 = vrot.lane.b32.xlu0 %v398_v17, %s1161_s26 }
  0x9b   : > { %653 = vrot.lane.b32.xlu1 %v638_v20, %s1161_s26  ;;  %651 = vrot.lane.b32.xlu0 %v637_v21, %s1161_s26  ;;  %v650_v21 = vsel %vm303_vm5, %v648_v56, 0.0 }
  0xe1   : > { %v598_v22 = vpop.permute.xlu1 %597  ;;  %v334_v23 = vpop.permute.xlu0 %333 }
  0xe2   : > { %v341_v53 = vmul.f32 %v891_v43, %v334_v23  ;;  %v601_v8 = vmul.f32 %v891_v43, %v598_v22  ;;  %v382_v23 = vmul.f32 %v1500_v5, %v1400_v7 }
  0xe4   : > { %v343_v15 = vsel %vm1492_vm6, %v341_v53, 0.0 }
  0xe5   : > { %v1465_v24 = vpop.permute.xlu1 %599  ;;  %v336_v25 = vpop.permute.xlu0 %335  ;;  %v438_v32 = vadd.f32 %v900_v14, %v343_v15 }
  0xe6   : > { %v342_v58 = vmul.f32 %v891_v43, %v336_v25  ;;  %v602_v25 = vmul.f32 %v891_v43, %v1465_v24  ;;  %v607_v24 = vsel %vm300_vm4, %v605_v47, 0.0 }
  0xe8   : > { %v344_v19 = vsel %vm304_vm2, %v342_v58, 0.0  ;;  %v381_v58 = vmul.f32 %v1500_v5, %v1398_v6 }
  0xe9   : > { %v356_v26 = vpop.permute.xlu1 %355  ;;  %v354_v27 = vpop.permute.xlu0 %353  ;;  %v439_v38 = vadd.f32 %v900_v14, %v344_v19 }
  0xea   : > { %v362_v16 = vmul.f32 %v893_v59, %v356_v26  ;;  %v361_v20 = vmul.f32 %v893_v59, %v354_v27 }
  0xec   : > { %v363_v43 = vsel %vm1522_vm7, %v361_v20, 0.0 }
  0xed   : > { %v1467_v28 = vpop.permute.xlu1 %611  ;;  %v1469_v29 = vpop.permute.xlu0 %609 }
  0xee   : > { %v613_v45 = vmul.f32 %v893_v59, %v1469_v29 }
  0xf1   : > { %v368_v30 = vpop.permute.xlu1 %367  ;;  %v366_v33 = vpop.permute.xlu0 %365 }
  0xf2   : > { %v374_v35 = vmul.f32 %v894_v31, %v368_v30  ;;  %v373_v39 = vmul.f32 %v894_v31, %v366_v33 }
  0xf4   : > { %v376_v46 = vsel %vm304_vm2, %v374_v35, 0.0  ;;  %v375_v49 = vsel %vm304_vm2, %v373_v39, 0.0  ;;  %v897_v35 = vld [vmem:[#allocation5 + $0x6] ss:$0 sm:$0xff]  ;;  %v364_v39 = vsel %vm305_vm3, %v362_v16, 0.0 }
  0xf5   : > { %v620_v40 = vpop.permute.xlu1 %619  ;;  %v618_v41 = vpop.permute.xlu0 %617  ;;  %v443_v60 = vadd.f32 %v376_v46, %v350_v42  ;;  %v442_v63 = vadd.f32 %v375_v49, %v351_v48  ;;  %v604_v48 = vsel %vm304_vm2, %v602_v25, 0.0  ;;  %v441_v53 = vadd.f32 %v439_v38, %v364_v39 }
  0xf6   : > { %v622_v0 = vmul.f32 %v894_v31, %v620_v40  ;;  %v621_v9 = vmul.f32 %v894_v31, %v618_v41  ;;  %v603_v31 = vsel %vm1492_vm6, %v601_v8, 0.0  ;;  %v614_v40 = vmul.f32 %v893_v59, %v1467_v28 }
  0xf7   : > { %v659_v8 = vadd.f32 %v900_v14, %v603_v31  ;;  %v445_v15 = vadd.f32 %v441_v53, %v382_v23 }
  0xf8   : > { %v624_v27 = vsel %vm304_vm2, %v622_v0, 0.0  ;;  %v623_v33 = vsel %vm304_vm2, %v621_v9, 0.0  ;;  %v616_v56 = vsel %vm305_vm3, %v614_v40, 0.0  ;;  %v626_v0 = vmul.f32 %v1394_v3, %v1500_v5 }
  0xf9   : > { %v386_v50 = vpop.permute.xlu1 %385  ;;  %v384_v55 = vpop.permute.xlu0 %383  ;;  %v664_v46 = vadd.f32 %v624_v27, %v606_v51  ;;  %v663_v49 = vadd.f32 %v623_v33, %v607_v24 }
  0xfa   : > { %v392_v54 = vmul.f32 %v896_v44, %v386_v50  ;;  %v391_v61 = vmul.f32 %v896_v44, %v384_v55  ;;  %v440_v55 = vadd.f32 %v438_v32, %v363_v43 }
  0xfc   : > { %v394_v4 = vsel %vm305_vm3, %v392_v54, 0.0  ;;  %v393_v11 = vsel %vm305_vm3, %v391_v61, 0.0  ;;  %v660_v61 = vadd.f32 %v900_v14, %v604_v48  ;;  %v444_v20 = vadd.f32 %v440_v55, %v381_v58 }
  0xfd   : > { %v447_v10 = vadd.f32 %v443_v60, %v394_v4  ;;  %v403_v12 = vpop.permute.xlu1 %402  ;;  %v446_v17 = vadd.f32 %v442_v63, %v393_v11  ;;  %v401_v18 = vpop.permute.xlu0 %400  ;;  %v899_v4 = vld [vmem:[#allocation5 + $0x8] ss:$0 sm:$0xff] }
  0xfe   : > { %v409_v50 = vmul.f32 %v897_v35, %v403_v12  ;;  %v408_v29 = vmul.f32 %v897_v35, %v401_v18  ;;  %v662_v12 = vadd.f32 %v660_v61, %v616_v56 }
  0xff   : > { %v1511_v22 = vadd.f32 %v447_v10, %v419_v62  ;;  %v1528_v30 = vadd.f32 %v446_v17, %v416_v52  ;;  %v615_v62 = vsel %vm1522_vm7, %v613_v45, 0.0 }
 0x100   : > { %v411_v9 = vsel %vm1550_vm8, %v409_v50, 0.0  ;;  %v410_v16 = vsel %vm304_vm2, %v408_v29, 0.0  ;;  %v661_v19 = vadd.f32 %v659_v8, %v615_v62  ;;  %v666_v33 = vadd.f32 %v662_v12, %v626_v0 }
 0x101   : > { %v630_v36 = vpop.permute.xlu1 %629  ;;  %v628_v42 = vpop.permute.xlu0 %627  ;;  %v449_v25 = vadd.f32 %v445_v15, %v411_v9  ;;  %v448_v31 = vadd.f32 %v444_v20, %v410_v16  ;;  %v904_v16 = vld [vmem:[#allocation7 + $0x3] ss:$0 sm:$0xff] }
 0x102   : > { %v632_v41 = vmul.f32 %v896_v44, %v630_v36  ;;  %v631_v47 = vmul.f32 %v896_v44, %v628_v42 }
 0x104   : > { %v634_v52 = vsel %vm305_vm3, %v632_v41, 0.0  ;;  %v633_v44 = vsel %vm305_vm3, %v631_v47, 0.0 }
 0x105   : > { %v668_v51 = vadd.f32 %v664_v46, %v634_v52  ;;  %v642_v54 = vpop.permute.xlu1 %641  ;;  %v667_v59 = vadd.f32 %v663_v49, %v633_v44  ;;  %v640_v60 = vpop.permute.xlu0 %639 }
 0x106   : > { %v644_v11 = vmul.f32 %v897_v35, %v642_v54  ;;  %v643_v17 = vmul.f32 %v897_v35, %v640_v60 }
 0x107   : > { %v672_v63 = vadd.f32 %v668_v51, %v650_v21  ;;  %v671_v10 = vadd.f32 %v667_v59, %v647_v13  ;;  %v625_v13 = vmul.f32 %v1392_v2, %v1500_v5 }
 0x108   : > { %v646_v32 = vsel %vm1550_vm8, %v644_v11, 0.0  ;;  %v645_v35 = vsel %vm304_vm2, %v643_v17, 0.0 }
 0x109   : > { %v423_v14 = vpop.permute.xlu1 %422  ;;  %v421_v23 = vpop.permute.xlu0 %420  ;;  %v665_v39 = vadd.f32 %v661_v19, %v625_v13  ;;  %v670_v43 = vadd.f32 %v666_v33, %v646_v32  ;;  %v902_v19 = vld [vmem:[#allocation7 + $0x1] ss:$0 sm:$0xff] }
 0x10a   : > { %v429_v21 = vmul.f32 %v899_v4, %v423_v14  ;;  %v428_v27 = vmul.f32 %v899_v4, %v421_v23 }
 0x10b   : > { %v669_v47 = vadd.f32 %v665_v39, %v645_v35 }
 0x10c   : > { %v431_v24 = vsel %vm1572_vm9, %v429_v21, 0.0  ;;  %v430_v38 = vsel %vm305_vm3, %v428_v27, 0.0  ;;  %v908_v27 = vld [vmem:[#allocation7 + $0x7] ss:$0 sm:$0xff] }
 0x10d   : > { %v453_v36 = vadd.f32 %v449_v25, %v431_v24  ;;  %v654_v5 = vpop.permute.xlu1 %653  ;;  %v452_v40 = vadd.f32 %v448_v31, %v430_v38  ;;  %v652_v42 = vpop.permute.xlu0 %651  ;;  %v906_v31 = vld [vmem:[#allocation7 + $0x5] ss:$0 sm:$0xff] }
 0x10e   : > { %v656_v41 = vmul.f32 %v899_v4, %v654_v5  ;;  %v655_v46 = vmul.f32 %v899_v4, %v652_v42 }
 0x10f   : > { %v455_v45 = vadd.f32 %v453_v36, %v1511_v22  ;;  %v454_v48 = vadd.f32 %v452_v40, %v1528_v30 }
 0x110   : > { %v658_v49 = vsel %vm1572_vm9, %v656_v41, 0.0  ;;  %v657_v53 = vsel %vm305_vm3, %v655_v46, 0.0 }
 0x111   : > { %v1590_v50 = vmax.f32 %v455_v45, 0.0  ;;  %v674_v52 = vadd.f32 %v670_v43, %v658_v49  ;;  %v1594_v29 = vmax.f32 %v454_v48, 0.0  ;;  %v673_v51 = vadd.f32 %v669_v47, %v657_v53 }
 0x113   : > { %v676_v44 = vadd.f32 %v674_v52, %v672_v63  ;;  %496 = vrot.lane.b32.xlu1 %v1590_v50, %s1160_s24  ;;  %v459_v22 = vrot.slane %v1590_v50, 7  ;;  %v525_v30 = vrot.slane %v1590_v50, 1  ;;  %v675_v54 = vadd.f32 %v673_v51, %v671_v10  ;;  %494 = vrot.lane.b32.xlu0 %v1594_v29, %s1160_s24 }
 0x114   : > { %v458_v55 = vrot.slane %v1594_v29, 7  ;;  %v524_v56 = vrot.slane %v1594_v29, 1 }
 0x115   : > { %v1604_v58 = vmax.f32 %v676_v44, 0.0  ;;  %v1606_v59 = vmax.f32 %v675_v54, 0.0 }
 0x116   : > { %v461_v60 = vsel %vm330_vm0, %v459_v22, %v458_v55  ;;  %v460_v61 = vsel %vm330_vm0, %v458_v55, %v459_v22  ;;  %v526_v62 = vsel %vm397_vm1, %v524_v56, %v525_v30  ;;  %v527_v4 = vsel %vm397_vm1, %v525_v30, %v524_v56 }
 0x117   : > { %705 = vrot.lane.b32.xlu1 %v1604_v58, %s1160_s24  ;;  %v680_v63 = vrot.slane %v1604_v58, 7  ;;  %703 = vrot.lane.b32.xlu0 %v1606_v59, %s1160_s24  ;;  %v679_v0 = vrot.slane %v1606_v59, 7  ;;  %v721_v8 = vrot.slane %v1606_v59, 1  ;;  %v722_v9 = vrot.slane %v1604_v58, 1 }
 0x118   : > { %v478_v25 = vmul.f32 %v902_v19, %v461_v60  ;;  %v479_v33 = vmul.f32 %v902_v19, %v460_v61  ;;  %v545_v5 = vmul.f32 %v908_v27, %v527_v4  ;;  %v544_v46 = vmul.f32 %v908_v27, %v526_v62 }
 0x119   : > { %v682_v10 = vsel %vm330_vm0, %v680_v63, %v679_v0  ;;  %v681_v11 = vsel %vm330_vm0, %v679_v0, %v680_v63  ;;  %v1630_v12 = vsel %vm397_vm1, %v721_v8, %v722_v9  ;;  %v724_v15 = vsel %vm397_vm1, %v722_v9, %v721_v8 }
 0x11a   : > { %v691_v41 = vmul.f32 %v902_v19, %v682_v10  ;;  %v480_v43 = vsel %vm300_vm4, %v478_v25, 0.0  ;;  %v692_v52 = vmul.f32 %v902_v19, %v681_v11  ;;  %v547_v30 = vsel %vm303_vm5, %v545_v5, 0.0 }
 0x11b   : > { %514 = vrot.lane.b32.xlu1 %v1590_v50, %s1161_s26  ;;  %512 = vrot.lane.b32.xlu0 %v1594_v29, %s1161_s26  ;;  %v734_v54 = vmul.f32 %v908_v27, %v724_v15 }
 0x11d   : > { %v736_v1 = vsel %vm303_vm5, %v734_v54, 0.0 }
 0x11f   : > { %715 = vrot.lane.b32.xlu1 %v1604_v58, %s1161_s26  ;;  %713 = vrot.lane.b32.xlu0 %v1606_v59, %s1161_s26 }
 0x123   : > { %464 = vrot.lane.b32.xlu1 %v460_v61, %s1160_s24  ;;  %462 = vrot.lane.b32.xlu0 %v461_v60, %s1160_s24 }
 0x127   : > { %685 = vrot.lane.b32.xlu1 %v681_v11, %s1160_s24  ;;  %683 = vrot.lane.b32.xlu0 %v682_v10, %s1160_s24 }
 0x12b   : > { %484 = vrot.lane.b32.xlu1 %v460_v61, %s1161_s26  ;;  %482 = vrot.lane.b32.xlu0 %v461_v60, %s1161_s26 }
 0x12f   : > { %697 = vrot.lane.b32.xlu1 %v681_v11, %s1161_s26  ;;  %695 = vrot.lane.b32.xlu0 %v682_v10, %s1161_s26 }
 0x133   : > { %530 = vrot.lane.b32.xlu1 %v527_v4, %s1160_s24  ;;  %528 = vrot.lane.b32.xlu0 %v526_v62, %s1160_s24 }
 0x137   : > { %727 = vrot.lane.b32.xlu1 %v724_v15, %s1160_s24  ;;  %725 = vrot.lane.b32.xlu0 %v1630_v12, %s1160_s24 }
 0x13b   : > { %550 = vrot.lane.b32.xlu1 %v527_v4, %s1161_s26  ;;  %548 = vrot.lane.b32.xlu0 %v526_v62, %s1161_s26  ;;  %v693_v62 = vsel %vm300_vm4, %v691_v41, 0.0  ;;  %v907_v41 = vld [vmem:[#allocation7 + $0x6] ss:$0 sm:$0xff] }
 0x13f   : > { %739 = vrot.lane.b32.xlu1 %v724_v15, %s1161_s26  ;;  %737 = vrot.lane.b32.xlu0 %v1630_v12, %s1161_s26  ;;  %s1089_s26 = scalar_lea.vmem %s1088_s12, 1024 }
 0x140   : > { %p1091_p9 = scmp.lt.s32.totalorder %s1089_s26, %s1083_s6 }
 0x142   : > { %p1092_p12 = por %p1091_p9, %p1090_p7 }
 0x144   : > { %p1093_p1 = pnand %p1092_p12, %p1086_p3 }
 0x185   : > { %v497_v17 = vpop.permute.xlu1 %496  ;;  %v495_v14 = vpop.permute.xlu0 %494 }
 0x186   : > { %v503_v20 = vmul.f32 %v904_v16, %v497_v17  ;;  %v502_v13 = vmul.f32 %v904_v16, %v495_v14 }
 0x188   : > { %v505_v32 = vsel %vm304_vm2, %v503_v20, 0.0  ;;  %v504_v35 = vsel %vm304_vm2, %v502_v13, 0.0 }
 0x189   : > { %v706_v21 = vpop.permute.xlu1 %705  ;;  %v704_v23 = vpop.permute.xlu0 %703  ;;  %v571_v42 = vadd.f32 %v505_v32, %v479_v33  ;;  %v570_v47 = vadd.f32 %v504_v35, %v480_v43  ;;  %v903_v32 = vld [vmem:[#allocation7 + $0x2] ss:$0 sm:$0xff] }
 0x18a   : > { %v708_v24 = vmul.f32 %v904_v16, %v706_v21  ;;  %v707_v36 = vmul.f32 %v904_v16, %v704_v23  ;;  %v733_v16 = vmul.f32 %v908_v27, %v1630_v12  ;;  %v901_v23 = vld [vmem:[#allocation7] ss:$0 sm:$0xff] }
 0x18c   : > { %v710_v48 = vsel %vm304_vm2, %v708_v24, 0.0  ;;  %v709_v53 = vsel %vm304_vm2, %v707_v36, 0.0 }
 0x18d   : > { %v515_v38 = vpop.permute.xlu1 %514  ;;  %v513_v40 = vpop.permute.xlu0 %512  ;;  %v750_v61 = vadd.f32 %v710_v48, %v692_v52  ;;  %v749_v4 = vadd.f32 %v709_v53, %v693_v62 }
 0x18e   : > { %v521_v39 = vmul.f32 %v906_v31, %v515_v38  ;;  %v520_v45 = vmul.f32 %v906_v31, %v513_v40 }
 0x190   : > { %v523_v49 = vsel %vm305_vm3, %v521_v39, 0.0  ;;  %v522_v44 = vsel %vm305_vm3, %v520_v45, 0.0 }
 0x191   : > { %v575_v51 = vadd.f32 %v571_v42, %v523_v49  ;;  %v716_v22 = vpop.permute.xlu1 %715  ;;  %v574_v55 = vadd.f32 %v570_v47, %v522_v44  ;;  %v714_v60 = vpop.permute.xlu0 %713 }
 0x192   : > { %v718_v56 = vmul.f32 %v906_v31, %v716_v22  ;;  %v717_v0 = vmul.f32 %v906_v31, %v714_v60 }
 0x193   : > { %v1678_v63 = vadd.f32 %v575_v51, %v547_v30  ;;  %v1680_v8 = vadd.f32 %v574_v55, %v544_v46  ;;  %v905_v51 = vld [vmem:[#allocation7 + $0x4] ss:$0 sm:$0xff] }
 0x194   : > { %v720_v9 = vsel %vm305_vm3, %v718_v56, 0.0  ;;  %v719_v11 = vsel %vm305_vm3, %v717_v0, 0.0 }
 0x195   : > { %v754_v10 = vadd.f32 %v750_v61, %v720_v9  ;;  %v465_v15 = vpop.permute.xlu1 %464  ;;  %v753_v17 = vadd.f32 %v749_v4, %v719_v11  ;;  %v463_v14 = vpop.permute.xlu0 %462  ;;  %v511_v4 = vmul.f32 %v905_v51, %v1590_v50  ;;  %v909_v9 = vld [vmem:[#allocation7 + $0x8] ss:$0 sm:$0xff]  ;;  %v510_v11 = vmul.f32 %v905_v51, %v1594_v29 }
 0x196   : > { %v471_v24 = vmul.f32 %v901_v23, %v465_v15  ;;  %v470_v33 = vmul.f32 %v901_v23, %v463_v14 }
 0x197   : > { %v1689_v19 = vadd.f32 %v754_v10, %v736_v1  ;;  %v1691_v20 = vadd.f32 %v753_v17, %v733_v16 }
 0x198   : > { %v473_v38 = vsel %vm304_vm2, %v471_v24, 0.0  ;;  %v472_v39 = vsel %vm1492_vm6, %v470_v33, 0.0  ;;  %v711_v24 = vmul.f32 %v905_v51, %v1606_v59 }
 0x199   : > { %v686_v13 = vpop.permute.xlu1 %685  ;;  %v684_v21 = vpop.permute.xlu0 %683  ;;  %v567_v47 = vadd.f32 %v910_v37, %v473_v38  ;;  %v566_v52 = vadd.f32 %v910_v37, %v472_v39 }
 0x19a   : > { %v688_v5 = vmul.f32 %v901_v23, %v686_v13  ;;  %v687_v40 = vmul.f32 %v901_v23, %v684_v21 }
 0x19c   : > { %v690_v53 = vsel %vm304_vm2, %v688_v5, 0.0  ;;  %v689_v22 = vsel %vm1492_vm6, %v687_v40, 0.0 }
 0x19d   : > { %v485_v25 = vpop.permute.xlu1 %484  ;;  %v483_v31 = vpop.permute.xlu0 %482  ;;  %v746_v62 = vadd.f32 %v910_v37, %v690_v53  ;;  %v745_v10 = vadd.f32 %v910_v37, %v689_v22 }
 0x19e   : > { %v491_v36 = vmul.f32 %v903_v32, %v485_v25  ;;  %v490_v27 = vmul.f32 %v903_v32, %v483_v31  ;;  %v712_v31 = vmul.f32 %v905_v51, %v1604_v58 }
 0x1a0   : > { %v493_v43 = vsel %vm305_vm3, %v491_v36, 0.0  ;;  %v492_v48 = vsel %vm1522_vm7, %v490_v27, 0.0 }
 0x1a1   : > { %v698_v35 = vpop.permute.xlu1 %697  ;;  %v696_v12 = vpop.permute.xlu0 %695  ;;  %v569_v30 = vadd.f32 %v567_v47, %v493_v43  ;;  %v568_v56 = vadd.f32 %v566_v52, %v492_v48 }
 0x1a2   : > { %v700_v45 = vmul.f32 %v903_v32, %v698_v35  ;;  %v699_v49 = vmul.f32 %v903_v32, %v696_v12 }
 0x1a3   : > { %v573_v17 = vadd.f32 %v569_v30, %v511_v4  ;;  %v572_v26 = vadd.f32 %v568_v56, %v510_v11 }
 0x1a4   : > { %v702_v60 = vsel %vm305_vm3, %v700_v45, 0.0  ;;  %v701_v0 = vsel %vm1522_vm7, %v699_v49, 0.0 }
 0x1a5   : > { %v531_v42 = vpop.permute.xlu1 %530  ;;  %v529_v46 = vpop.permute.xlu0 %528  ;;  %v748_v16 = vadd.f32 %v746_v62, %v702_v60  ;;  %v747_v21 = vadd.f32 %v745_v10, %v701_v0 }
 0x1a6   : > { %v537_v44 = vmul.f32 %v907_v41, %v531_v42  ;;  %v536_v54 = vmul.f32 %v907_v41, %v529_v46 }
 0x1a7   : > { %v752_v12 = vadd.f32 %v748_v16, %v712_v31  ;;  %v751_v58 = vadd.f32 %v747_v21, %v711_v24 }
 0x1a8   : > { %v539_v57 = vsel %vm1550_vm8, %v537_v44, 0.0  ;;  %v538_v1 = vsel %vm304_vm2, %v536_v54, 0.0 }
 0x1a9   : > { %v728_v55 = vpop.permute.xlu1 %727  ;;  %v726_v61 = vpop.permute.xlu0 %725  ;;  %v577_v50 = vadd.f32 %v573_v17, %v539_v57  ;;  %v576_v29 = vadd.f32 %v572_v26, %v538_v1 }
 0x1aa   : > { %v730_v15 = vmul.f32 %v907_v41, %v728_v55  ;;  %v729_v14 = vmul.f32 %v907_v41, %v726_v61 }
 0x1ac   : > { %v732_v33 = vsel %vm1550_vm8, %v730_v15, 0.0  ;;  %v731_v36 = vsel %vm304_vm2, %v729_v14, 0.0 }
 0x1ad   : > { %v551_v13 = vpop.permute.xlu1 %550  ;;  %v549_v23 = vpop.permute.xlu0 %548  ;;  %v756_v59 = vadd.f32 %v752_v12, %v732_v33  ;;  %v755_v42 = vadd.f32 %v751_v58, %v731_v36 }
 0x1ae   : > { %v557_v25 = vmul.f32 %v909_v9, %v551_v13  ;;  %v556_v32 = vmul.f32 %v909_v9, %v549_v23 }
 0x1b0   : > { %v559_v35 = vsel %vm1572_vm9, %v557_v25, 0.0  ;;  %v558_v27 = vsel %vm305_vm3, %v556_v32, 0.0 }
 0x1b1   : > { %v581_v37 = vadd.f32 %v577_v50, %v559_v35  ;;  %v740_v38 = vpop.permute.xlu1 %739  ;;  %v580_v5 = vadd.f32 %v576_v29, %v558_v27  ;;  %v738_v39 = vpop.permute.xlu0 %737 }
 0x1b2   : > { %v742_v40 = vmul.f32 %v909_v9, %v740_v38  ;;  %v741_v41 = vmul.f32 %v909_v9, %v738_v39 }
 0x1b3   : > { %v583_v28 = vadd.f32 %v581_v37, %v1678_v63  ;;  %v582_v43 = vadd.f32 %v580_v5, %v1680_v8 }
 0x1b4   : > { %v744_v45 = vsel %vm1572_vm9, %v742_v40, 0.0  ;;  %v743_v47 = vsel %vm305_vm3, %v741_v41, 0.0 }
 0x1b5   : > { %v585_v46 = vadd.f32 %v583_v28, %v1400_v7  ;;  %v760_v48 = vadd.f32 %v756_v59, %v744_v45  ;;  %v584_v49 = vadd.f32 %v582_v43, %v1398_v6  ;;  %v759_v52 = vadd.f32 %v755_v42, %v743_v47 }
 0x1b7   : > { %v587_v53 = vmax.f32 %v585_v46, 0.0  ;;  %v762_v51 = vadd.f32 %v760_v48, %v1689_v19  ;;  %v586_v63 = vmax.f32 %v584_v49, 0.0  ;;  %v761_v44 = vadd.f32 %v759_v52, %v1691_v20 }
 0x1b9   : > { %589 = vst [vmem:[%s272_s9 + $0x8] sm:$0xff] %v587_v53  ;;  %v764_v7 = vadd.f32 %v1394_v3, %v762_v51  ;;  %588 = vst [vmem:[%s272_s9] sm:$0xff] %v586_v63  ;;  %v763_v34 = vadd.f32 %v1392_v2, %v761_v44 }
 0x1bb   : > { %v766_v6 = vmax.f32 %v764_v7, 0.0  ;;  %v765_v18 = vmax.f32 %v763_v34, 0.0 }
 0x1bd   : > { %914 = vst [vmem:[%s272_s9 + $0x18] sm:$0xff] %v766_v6  ;;  %913 = vst [vmem:[%s272_s9 + $0x10] sm:$0xff] %v765_v18 }
 0x1be   : > { %1096 = shalt.err (!%p1093_p1)
}
 0x1bf   : > { %s1097_s15 = scalar_lea.hbm %s1746_s7, 512  ;;  %s1101_s28 = scalar_lea.hbm %s1798_s5, 1024 }
 0x1c0   : > { %p1098_p13 = scmp.ne.s32.totalorder %s1746_s7, %s1097_s15  ;;  %p1102_p4 = scmp.lt.u32.totalorder %s1746_s7, %s1798_s5 }
 0x1c1   : > { %p1103_p5 = scmp.lt.u32.totalorder %s1101_s28, %s1097_s15  ;;  %p1105_p11 = scmp.lt.u32.totalorder %s1097_s15, %s1746_s7 }
 0x1c2   : > { %p1099_p6 = pnand %p1098_p13, %p1820_p0 }
 0x1c3   : > { %p1104_p8 = por %p1103_p5, %p1102_p4 }
 0x1c4   : > { %p1100_p10 = pneg %p1099_p6 }
 0x1c5   : > { %p1106_p2 = por %p1105_p11, %p1104_p8 }
 0x1c7   : > { %p1107_p3 = pnand %p1106_p2, %p1100_p10 }
 0x1c9   : > { %1110 = shalt.err (!%p1107_p3)
}
 0x1ca   : > { %s1163_s11 = smov 128  }
 0x1cb   : > { %935 = dma.vmem_to_hbm [thread:$0]  (%p1820_p0), %s1748_s30, 512, %s1746_s7, %s771_s22, %s1163_s11, %s1163_s11, %s1160_s24  }
 0x1cc PF: > { %s800_s17 = sand.u32 1, %s1141_s18   ;;  %p1821_p7 = scmp.ne.s32.totalorder %s1803_s25, 0 }
 0x1cd   : > { %p1822_p9 = scmp.ge.s32.totalorder %s1153_s21, 2  ;;  %s801_s6 = scalar_lea.sflag [#allocation4], %s800_s17 }
 0x1cf   : > { %p949_p12 = pnand %p1822_p9, %p1821_p7 }
 0x1d1   : > { %1136 = dma.done.wait (!%p949_p12), %s801_s6, 512  }
 0x1d2   : > { %1138 = vsyncadd (!%p949_p12), %s801_s6, 4294966784  ;;  %p19_p1 = scmp.ge.s32.totalorder %s1310_s29, 4   ;;  %s1823_s18 = smov %s1145_s19 }
 0x1d3   : > { %s1824_s19 = smov %s1149_s20  ;;  %s1825_s20 = smov %s1326_s27 }
 0x1d4   : > { %s1826_s21 = smov %s1310_s29  ;;  %21 = sbr.rel (!%p19_p1) target bundleno = 6 (0x6), region = 95 }
 0x1db   :  { %806 = vsyncpa [#allocation3], 1 }
 0x1dc   :  { %808 = vsyncpa [#allocation3 + $0x1], 1 }
 0x1dd   :  { %809 = vsyncpa [#allocation6], 1 }
 0x1de   :  { %810 = vsyncpa [#allocation4], 1 }
 0x1df   :  { %812 = vsyncpa [#allocation4 + $0x1], 1 }

</bundles_post_ra>
